<compile_context>
chip_gen: v5e
topology: v5e:2x2
jax: 0.10.0
libtpu: 0.0.40
codegen_flags: <defaults>
</compile_context>

<pallas_src>
import functools
import math

import jax
import jax.numpy as jnp
import numpy as np
from jax.experimental import pallas as pl
from jax.experimental.pallas import tpu as pltpu


# ----------------------------------------------------------------------------
# in-kernel helpers (traced inside the Pallas kernel)
# ----------------------------------------------------------------------------

def _pw_conv(v, w, b, relu):
    """1x1 conv + folded BN: (Cout, Cin) @ (Cin, N) + bias (Cout, 1)."""
    y = jnp.dot(w, v, preferred_element_type=jnp.float32) + b
    return jnp.maximum(y, 0.0) if relu else y


def _dw_conv(v, w, b, kh, kw, w_grid, wcoord, relu):
    """Depthwise (kh,kw) conv + folded BN on a (C, N) slab of flattened pixels.

    v      : (C, N) f32, pixels of an (Hg, w_grid) grid flattened h-major onto
             the lane dim (N a multiple of 128; lanes >= Hg*w_grid are padding).
    w      : (C, kh*kw) BN-folded per-channel tap weights (row-major taps).
    b      : (C, 1)  BN-folded bias.
    wcoord : (1, N) int32, w-coordinate (flat % w_grid) of every lane.
    The conv's spatial zero padding is reproduced exactly by a 128-lane zero
    pad on both sides (vertical out-of-range reads) plus a w-coordinate mask
    (horizontal wrap across image rows).
    """
    C, N = v.shape
    pad = 128                                          # >= max |dh*w_grid + dw|
    zeros = jnp.zeros((C, pad), v.dtype)
    vp = jnp.concatenate([zeros, v, zeros], axis=1)    # lane-aligned concat
    acc = jnp.zeros((C, N), jnp.float32)
    t = 0
    for dh in range(-(kh // 2), kh // 2 + 1):
        for dw in range(-(kw // 2), kw // 2 + 1):
            s = dh * w_grid + dw
            tap = vp[:, pad + s: pad + s + N]          # static lane-shifted window
            if dw > 0:
                tap = jnp.where(wcoord < w_grid - dw, tap, 0.0)
            elif dw < 0:
                tap = jnp.where(wcoord >= -dw, tap, 0.0)
            acc = acc + tap * w[:, t:t + 1]
            t += 1
    y = acc + b
    return jnp.maximum(y, 0.0) if relu else y


# ----------------------------------------------------------------------------
# The fused bottleneck kernel: one grid step == one image
# ----------------------------------------------------------------------------

def _bottleneck_kernel(
        x_ref, pool_ref, up_ref, wcf_ref, wch_ref, hval_ref,
        g1p_w, g1p_b, g1c_w, g1c_b,
        s1_w, s1_b, s2_w, s2_b, s3_w, s3_b,
        g2p_w, g2p_b, g2c_w, g2c_b,
        o_ref, *, W, mid_ch, out_ch):
    f32 = jnp.float32
    x = x_ref[0]                 # (Cin, H*W)  input slab == residual
    wcf = wcf_ref[...]           # (1, H*W)    int32 w-coordinates, full res
    wch = wch_ref[...]           # (1, NH)     int32 w-coordinates, half res
    hval = hval_ref[...]         # (1, NH)     1.0 on real half-res pixels, else 0

    # ---- ghost1: DFC-attention ("short") branch at half resolution ----------
    xp = jnp.dot(x, pool_ref[...], preferred_element_type=f32)       # 2x2 avg-pool
    r = _pw_conv(xp, s1_w[...], s1_b[...], relu=False) * hval        # 1x1 + BN
    r = _dw_conv(r, s2_w[...], s2_b[...], 1, 5, W // 2, wch, relu=False) * hval
    r = _dw_conv(r, s3_w[...], s3_b[...], 5, 1, W // 2, wch, relu=False)
    # TODO(synk): the PyTorch source passes a 3-element `size` to F.interpolate
    # on a 4-D tensor (upstream GhostNetV2 typo); implemented here as the
    # intended 2-D nearest x2 upsample of the sigmoid gate (a 0/1 matmul).
    gate = jnp.dot(jax.nn.sigmoid(r), up_ref[...], preferred_element_type=f32)

    # ---- ghost1: primary 1x1 + cheap depthwise 3x3 (both ReLU) --------------
    x1 = _pw_conv(x, g1p_w[...], g1p_b[...], relu=True)
    x2 = _dw_conv(x1, g1c_w[...], g1c_b[...], 3, 3, W, wcf, relu=True)
    h = jnp.concatenate([x1, x2], axis=0)[:mid_ch] * gate             # gated ghosts

    # ---- ghost2 (original mode, no ReLU) -------------------------------------
    y1 = _pw_conv(h, g2p_w[...], g2p_b[...], relu=False)
    y2 = _dw_conv(y1, g2c_w[...], g2c_b[...], 3, 3, W, wcf, relu=False)
    y = jnp.concatenate([y1, y2], axis=0)[:out_ch]

    # ---- identity shortcut (stride == 1, in_channels == out_channels) -------
    o_ref[0] = (y + x).astype(o_ref.dtype)


# ----------------------------------------------------------------------------
# host-side constants, parameter folding, public wrapper
# ----------------------------------------------------------------------------

def _aux_constants(H, W):
    """Pooling / upsampling matrices and lane-coordinate masks (host constants)."""
    HW = H * W
    HW4 = (H // 2) * (W // 2)
    NH = ((HW4 + 127) // 128) * 128            # half-res slab width, lane aligned
    p = np.arange(HW)
    q_of_p = (p // W // 2) * (W // 2) + (p % W) // 2     # half-res pixel of pixel p
    pool = np.zeros((HW, NH), np.float32)
    pool[p, q_of_p] = 0.25                     # 2x2 average pooling
    up = np.zeros((NH, HW), np.float32)
    up[q_of_p, p] = 1.0                        # nearest x2 upsampling
    wcf = (p % W).astype(np.int32)[None, :]
    q = np.arange(NH)
    wch = np.where(q < HW4, q % (W // 2), -1).astype(np.int32)[None, :]
    hval = (q < HW4).astype(np.float32)[None, :]
    return tuple(jnp.asarray(a) for a in (pool, up, wcf, wch, hval))


def ghostnet_bottleneck_v2(x_nchw, params):
    """GhostNetBottleneckV2.forward (stride=1, se_ratio=0.0, in_ch == out_ch)."""
    B, cin, H, W = x_nchw.shape
    mid_ch, out_ch = params["mid_ch"], params["out_ch"]
    assert cin == out_ch, "identity shortcut needs in_channels == out_channels"
    assert H % 2 == 0 and W % 2 == 0, "2x2 avg-pool needs even H, W"
    HW = H * W
    assert HW % 128 == 0 and W + 1 <= 128, "lane-tiling assumptions of this kernel"

    consts = _aux_constants(H, W)
    tensors = params["tensors"]
    x2 = x_nchw.reshape(B, cin, HW)            # free reshape: NCHW with H,W merged

    def rep(a):                                # whole array, replicated over grid
        nd = a.ndim
        return pl.BlockSpec(a.shape, lambda b: (0,) * nd)

    kernel = functools.partial(_bottleneck_kernel, W=W, mid_ch=mid_ch, out_ch=out_ch)
    out = pl.pallas_call(
        kernel,
        out_shape=jax.ShapeDtypeStruct((B, out_ch, HW), jnp.float32),
        grid=(B,),
        in_specs=[pl.BlockSpec((1, cin, HW), lambda b: (b, 0, 0))]
        + [rep(a) for a in consts]
        + [rep(a) for a in tensors],
        out_specs=pl.BlockSpec((1, out_ch, HW), lambda b: (b, 0, 0)),
        # Batch images are independent; on v7x this axis can be split across the
        # two TensorCores, on v5e/v6e it is just a 2-step loop.
        compiler_params=pltpu.CompilerParams(dimension_semantics=("parallel",)),
    )(x2, *consts, *tensors)
    return out.reshape(B, out_ch, H, W)


def _bn_fold(key, c, eps=1e-5):
    """Eval-mode BatchNorm -> per-channel (scale, bias)."""
    k1, k2, k3, k4 = jax.random.split(key, 4)
    gamma = 1.0 + 0.1 * jax.random.normal(k1, (c,), jnp.float32)
    beta = 0.1 * jax.random.normal(k2, (c,), jnp.float32)
    mean = 0.1 * jax.random.normal(k3, (c,), jnp.float32)
    var = jax.random.uniform(k4, (c,), jnp.float32, 0.5, 1.5)
    s = gamma / jnp.sqrt(var + eps)
    return s, beta - mean * s


def _fold_pw(w, bn):
    """Fold BN into a 1x1 conv: w (cout, cin) -> (scaled weight, bias column)."""
    s, b = bn
    return w * s[:, None], b[:, None]


def _fold_dw(w, bn):
    """Fold BN into a depthwise conv: w (c, kh, kw) -> ((c, kh*kw), bias column)."""
    s, b = bn
    return w.reshape(w.shape[0], -1) * s[:, None], b[:, None]


def make_params(key, in_ch, mid_ch, out_ch):
    keys = iter(jax.random.split(key, 16))
    conv = lambda shape: 0.1 * jax.random.normal(next(keys), shape, jnp.float32)
    init1 = math.ceil(mid_ch / 2)   # ghost ratio = 2 -> new_channels == init_channels
    init2 = math.ceil(out_ch / 2)
    # ghost1 (mode='attn'): primary 1x1, cheap dw3x3, short 1x1 + dw(1,5) + dw(5,1)
    g1p = _fold_pw(conv((init1, in_ch)), _bn_fold(next(keys), init1))
    g1c = _fold_dw(conv((init1, 3, 3)), _bn_fold(next(keys), init1))
    s1 = _fold_pw(conv((mid_ch, in_ch)), _bn_fold(next(keys), mid_ch))
    s2 = _fold_dw(conv((mid_ch, 1, 5)), _bn_fold(next(keys), mid_ch))
    s3 = _fold_dw(conv((mid_ch, 5, 1)), _bn_fold(next(keys), mid_ch))
    # ghost2 (mode='original'): primary 1x1 + cheap dw3x3 (no ReLU)
    g2p = _fold_pw(conv((init2, mid_ch)), _bn_fold(next(keys), init2))
    g2c = _fold_dw(conv((init2, 3, 3)), _bn_fold(next(keys), init2))
    tensors = (*g1p, *g1c, *s1, *s2, *s3, *g2p, *g2c)
    return dict(mid_ch=mid_ch, out_ch=out_ch, tensors=tensors)


# --------------------------------- main ---------------------------------------

if __name__ == "__main__":
    key = jax.random.PRNGKey(0)
    kx, kp = jax.random.split(key)
    B, C_in, H, W = 2, 16, 16, 16
    C_mid, C_out = 32, 16              # in == out & stride == 1 -> identity shortcut

    x = jax.random.normal(kx, (B, C_in, H, W), jnp.float32)   # PyTorch-style NCHW
    params = make_params(kp, C_in, C_mid, C_out)

    y = jax.block_until_ready(ghostnet_bottleneck_v2(x, params))
    assert y.shape == (B, C_out, H, W) and y.dtype == jnp.float32
    assert bool(jnp.all(jnp.isfinite(y)))
    print("KERNEL_OK")
</pallas_src>

<mosaic_0001>
module attributes {stable_mosaic.version = 11 : i64} {
  func.func @_bottleneck_kernel(%arg0: i32, %arg1: memref<1x16x256xf32, #tpu.memory_space<vmem>>, %arg2: memref<256x128xf32, #tpu.memory_space<vmem>>, %arg3: memref<128x256xf32, #tpu.memory_space<vmem>>, %arg4: memref<1x256xi32, #tpu.memory_space<vmem>>, %arg5: memref<1x128xi32, #tpu.memory_space<vmem>>, %arg6: memref<1x128xf32, #tpu.memory_space<vmem>>, %arg7: memref<16x16xf32, #tpu.memory_space<vmem>>, %arg8: memref<16x1xf32, #tpu.memory_space<vmem>>, %arg9: memref<16x9xf32, #tpu.memory_space<vmem>>, %arg10: memref<16x1xf32, #tpu.memory_space<vmem>>, %arg11: memref<32x16xf32, #tpu.memory_space<vmem>>, %arg12: memref<32x1xf32, #tpu.memory_space<vmem>>, %arg13: memref<32x5xf32, #tpu.memory_space<vmem>>, %arg14: memref<32x1xf32, #tpu.memory_space<vmem>>, %arg15: memref<32x5xf32, #tpu.memory_space<vmem>>, %arg16: memref<32x1xf32, #tpu.memory_space<vmem>>, %arg17: memref<8x32xf32, #tpu.memory_space<vmem>>, %arg18: memref<8x1xf32, #tpu.memory_space<vmem>>, %arg19: memref<8x9xf32, #tpu.memory_space<vmem>>, %arg20: memref<8x1xf32, #tpu.memory_space<vmem>>, %arg21: memref<1x16x256xf32, #tpu.memory_space<vmem>>) attributes {dimension_semantics = [#tpu.dimension_semantics<parallel>], iteration_bounds = array<i64: 2>, scalar_prefetch = 0 : i64, scratch_operands = 0 : i64, tpu.core_type = #tpu.core_type<tc>, window_params = [{transform_indices = @transform_0, window_bounds = array<i64: 1, 16, 256>}, {pipeline_mode = #tpu.pipeline_mode<synchronous>, transform_indices = @transform_1, window_bounds = array<i64: 256, 128>}, {pipeline_mode = #tpu.pipeline_mode<synchronous>, transform_indices = @transform_2, window_bounds = array<i64: 128, 256>}, {pipeline_mode = #tpu.pipeline_mode<synchronous>, transform_indices = @transform_3, window_bounds = array<i64: 1, 256>}, {pipeline_mode = #tpu.pipeline_mode<synchronous>, transform_indices = @transform_4, window_bounds = array<i64: 1, 128>}, {pipeline_mode = #tpu.pipeline_mode<synchronous>, transform_indices = @transform_5, window_bounds = array<i64: 1, 128>}, {pipeline_mode = #tpu.pipeline_mode<synchronous>, transform_indices = @transform_6, window_bounds = array<i64: 16, 16>}, {pipeline_mode = #tpu.pipeline_mode<synchronous>, transform_indices = @transform_7, window_bounds = array<i64: 16, 1>}, {pipeline_mode = #tpu.pipeline_mode<synchronous>, transform_indices = @transform_8, window_bounds = array<i64: 16, 9>}, {pipeline_mode = #tpu.pipeline_mode<synchronous>, transform_indices = @transform_9, window_bounds = array<i64: 16, 1>}, {pipeline_mode = #tpu.pipeline_mode<synchronous>, transform_indices = @transform_10, window_bounds = array<i64: 32, 16>}, {pipeline_mode = #tpu.pipeline_mode<synchronous>, transform_indices = @transform_11, window_bounds = array<i64: 32, 1>}, {pipeline_mode = #tpu.pipeline_mode<synchronous>, transform_indices = @transform_12, window_bounds = array<i64: 32, 5>}, {pipeline_mode = #tpu.pipeline_mode<synchronous>, transform_indices = @transform_13, window_bounds = array<i64: 32, 1>}, {pipeline_mode = #tpu.pipeline_mode<synchronous>, transform_indices = @transform_14, window_bounds = array<i64: 32, 5>}, {pipeline_mode = #tpu.pipeline_mode<synchronous>, transform_indices = @transform_15, window_bounds = array<i64: 32, 1>}, {pipeline_mode = #tpu.pipeline_mode<synchronous>, transform_indices = @transform_16, window_bounds = array<i64: 8, 32>}, {pipeline_mode = #tpu.pipeline_mode<synchronous>, transform_indices = @transform_17, window_bounds = array<i64: 8, 1>}, {pipeline_mode = #tpu.pipeline_mode<synchronous>, transform_indices = @transform_18, window_bounds = array<i64: 8, 9>}, {pipeline_mode = #tpu.pipeline_mode<synchronous>, transform_indices = @transform_19, window_bounds = array<i64: 8, 1>}, {transform_indices = @transform_20, window_bounds = array<i64: 1, 16, 256>}]} {
    %c0 = arith.constant 0 : index
    %c0_0 = arith.constant 0 : index
    %c0_1 = arith.constant 0 : index
    %0 = vector.load %arg1[%c0, %c0_0, %c0_1] : memref<1x16x256xf32, #tpu.memory_space<vmem>>, vector<1x16x256xf32>
    %1 = vector.shape_cast %0 : vector<1x16x256xf32> to vector<16x256xf32>
    %c0_2 = arith.constant 0 : index
    %c0_3 = arith.constant 0 : index
    %2 = vector.load %arg4[%c0_2, %c0_3] : memref<1x256xi32, #tpu.memory_space<vmem>>, vector<1x256xi32>
    %c0_4 = arith.constant 0 : index
    %c0_5 = arith.constant 0 : index
    %3 = vector.load %arg5[%c0_4, %c0_5] : memref<1x128xi32, #tpu.memory_space<vmem>>, vector<1x128xi32>
    %c0_6 = arith.constant 0 : index
    %c0_7 = arith.constant 0 : index
    %4 = vector.load %arg6[%c0_6, %c0_7] : memref<1x128xf32, #tpu.memory_space<vmem>>, vector<1x128xf32>
    %c0_8 = arith.constant 0 : index
    %c0_9 = arith.constant 0 : index
    %5 = vector.load %arg2[%c0_8, %c0_9] : memref<256x128xf32, #tpu.memory_space<vmem>>, vector<256x128xf32>
    %cst = arith.constant dense<0.000000e+00> : vector<16x128xf32>
    %6 = tpu.matmul %1, %5, %cst {dimension_numbers = #tpu.dot_dimension_numbers<[1], [0], [0], [1], [0, 0, 1, 1], [], []>} : vector<16x256xf32>, vector<256x128xf32>, vector<16x128xf32> -> vector<16x128xf32>
    %c0_10 = arith.constant 0 : index
    %c0_11 = arith.constant 0 : index
    %7 = vector.load %arg11[%c0_10, %c0_11] : memref<32x16xf32, #tpu.memory_space<vmem>>, vector<32x16xf32>
    %c0_12 = arith.constant 0 : index
    %c0_13 = arith.constant 0 : index
    %8 = vector.load %arg12[%c0_12, %c0_13] : memref<32x1xf32, #tpu.memory_space<vmem>>, vector<32x1xf32>
    %cst_14 = arith.constant dense<0.000000e+00> : vector<32x128xf32>
    %9 = tpu.matmul %7, %6, %cst_14 {dimension_numbers = #tpu.dot_dimension_numbers<[1], [0], [0], [1], [0, 0, 1, 1], [], []>} : vector<32x16xf32>, vector<16x128xf32>, vector<32x128xf32> -> vector<32x128xf32>
    %10 = vector.broadcast %8 : vector<32x1xf32> to vector<32x128xf32>
    %11 = arith.addf %9, %10 : vector<32x128xf32>
    %12 = vector.broadcast %4 : vector<1x128xf32> to vector<32x128xf32>
    %13 = arith.mulf %11, %12 : vector<32x128xf32>
    %c0_15 = arith.constant 0 : index
    %c0_16 = arith.constant 0 : index
    %14 = vector.load %arg13[%c0_15, %c0_16] : memref<32x5xf32, #tpu.memory_space<vmem>>, vector<32x5xf32>
    %c0_17 = arith.constant 0 : index
    %c0_18 = arith.constant 0 : index
    %15 = vector.load %arg14[%c0_17, %c0_18] : memref<32x1xf32, #tpu.memory_space<vmem>>, vector<32x1xf32>
    %cst_19 = arith.constant 0.000000e+00 : f32
    %16 = vector.broadcast %cst_19 : f32 to vector<32x128xf32>
    %17 = tpu.concatenate %16, %13, %16 in 1 : vector<32x128xf32>, vector<32x128xf32>, vector<32x128xf32> -> vector<32x384xf32>
    %cst_20 = arith.constant 0.000000e+00 : f32
    %18 = vector.broadcast %cst_20 : f32 to vector<32x128xf32>
    %19 = vector.extract_strided_slice %17 {offsets = [0, 126], sizes = [32, 128], strides = [1, 1]} : vector<32x384xf32> to vector<32x128xf32>
    %c2_i32 = arith.constant 2 : i32
    %20 = vector.broadcast %c2_i32 : i32 to vector<1x128xi32>
    %21 = arith.cmpi sge, %3, %20 : vector<1x128xi32>
    %cst_21 = arith.constant 0.000000e+00 : f32
    %22 = vector.shape_cast %21 : vector<1x128xi1> to vector<1x128xi1>
    %23 = vector.broadcast %22 : vector<1x128xi1> to vector<32x128xi1>
    %24 = vector.broadcast %cst_21 : f32 to vector<32x128xf32>
    %25 = arith.select %23, %19, %24 : vector<32x128xi1>, vector<32x128xf32>
    %26 = vector.extract_strided_slice %14 {offsets = [0, 0], sizes = [32, 1], strides = [1, 1]} : vector<32x5xf32> to vector<32x1xf32>
    %27 = vector.broadcast %26 : vector<32x1xf32> to vector<32x128xf32>
    %28 = arith.mulf %25, %27 : vector<32x128xf32>
    %29 = arith.addf %18, %28 : vector<32x128xf32>
    %30 = vector.extract_strided_slice %17 {offsets = [0, 127], sizes = [32, 128], strides = [1, 1]} : vector<32x384xf32> to vector<32x128xf32>
    %c1_i32 = arith.constant 1 : i32
    %31 = vector.broadcast %c1_i32 : i32 to vector<1x128xi32>
    %32 = arith.cmpi sge, %3, %31 : vector<1x128xi32>
    %cst_22 = arith.constant 0.000000e+00 : f32
    %33 = vector.shape_cast %32 : vector<1x128xi1> to vector<1x128xi1>
    %34 = vector.broadcast %33 : vector<1x128xi1> to vector<32x128xi1>
    %35 = vector.broadcast %cst_22 : f32 to vector<32x128xf32>
    %36 = arith.select %34, %30, %35 : vector<32x128xi1>, vector<32x128xf32>
    %37 = vector.extract_strided_slice %14 {offsets = [0, 1], sizes = [32, 1], strides = [1, 1]} : vector<32x5xf32> to vector<32x1xf32>
    %38 = vector.broadcast %37 : vector<32x1xf32> to vector<32x128xf32>
    %39 = arith.mulf %36, %38 : vector<32x128xf32>
    %40 = arith.addf %29, %39 : vector<32x128xf32>
    %41 = vector.extract_strided_slice %17 {offsets = [0, 128], sizes = [32, 128], strides = [1, 1]} : vector<32x384xf32> to vector<32x128xf32>
    %42 = vector.extract_strided_slice %14 {offsets = [0, 2], sizes = [32, 1], strides = [1, 1]} : vector<32x5xf32> to vector<32x1xf32>
    %43 = vector.broadcast %42 : vector<32x1xf32> to vector<32x128xf32>
    %44 = arith.mulf %41, %43 : vector<32x128xf32>
    %45 = arith.addf %40, %44 : vector<32x128xf32>
    %46 = vector.extract_strided_slice %17 {offsets = [0, 129], sizes = [32, 128], strides = [1, 1]} : vector<32x384xf32> to vector<32x128xf32>
    %c7_i32 = arith.constant 7 : i32
    %47 = vector.broadcast %c7_i32 : i32 to vector<1x128xi32>
    %48 = arith.cmpi slt, %3, %47 : vector<1x128xi32>
    %cst_23 = arith.constant 0.000000e+00 : f32
    %49 = vector.shape_cast %48 : vector<1x128xi1> to vector<1x128xi1>
    %50 = vector.broadcast %49 : vector<1x128xi1> to vector<32x128xi1>
    %51 = vector.broadcast %cst_23 : f32 to vector<32x128xf32>
    %52 = arith.select %50, %46, %51 : vector<32x128xi1>, vector<32x128xf32>
    %53 = vector.extract_strided_slice %14 {offsets = [0, 3], sizes = [32, 1], strides = [1, 1]} : vector<32x5xf32> to vector<32x1xf32>
    %54 = vector.broadcast %53 : vector<32x1xf32> to vector<32x128xf32>
    %55 = arith.mulf %52, %54 : vector<32x128xf32>
    %56 = arith.addf %45, %55 : vector<32x128xf32>
    %57 = vector.extract_strided_slice %17 {offsets = [0, 130], sizes = [32, 128], strides = [1, 1]} : vector<32x384xf32> to vector<32x128xf32>
    %c6_i32 = arith.constant 6 : i32
    %58 = vector.broadcast %c6_i32 : i32 to vector<1x128xi32>
    %59 = arith.cmpi slt, %3, %58 : vector<1x128xi32>
    %cst_24 = arith.constant 0.000000e+00 : f32
    %60 = vector.shape_cast %59 : vector<1x128xi1> to vector<1x128xi1>
    %61 = vector.broadcast %60 : vector<1x128xi1> to vector<32x128xi1>
    %62 = vector.broadcast %cst_24 : f32 to vector<32x128xf32>
    %63 = arith.select %61, %57, %62 : vector<32x128xi1>, vector<32x128xf32>
    %64 = vector.extract_strided_slice %14 {offsets = [0, 4], sizes = [32, 1], strides = [1, 1]} : vector<32x5xf32> to vector<32x1xf32>
    %65 = vector.broadcast %64 : vector<32x1xf32> to vector<32x128xf32>
    %66 = arith.mulf %63, %65 : vector<32x128xf32>
    %67 = arith.addf %56, %66 : vector<32x128xf32>
    %68 = vector.broadcast %15 : vector<32x1xf32> to vector<32x128xf32>
    %69 = arith.addf %67, %68 : vector<32x128xf32>
    %70 = vector.broadcast %4 : vector<1x128xf32> to vector<32x128xf32>
    %71 = arith.mulf %69, %70 : vector<32x128xf32>
    %c0_25 = arith.constant 0 : index
    %c0_26 = arith.constant 0 : index
    %72 = vector.load %arg15[%c0_25, %c0_26] : memref<32x5xf32, #tpu.memory_space<vmem>>, vector<32x5xf32>
    %c0_27 = arith.constant 0 : index
    %c0_28 = arith.constant 0 : index
    %73 = vector.load %arg16[%c0_27, %c0_28] : memref<32x1xf32, #tpu.memory_space<vmem>>, vector<32x1xf32>
    %cst_29 = arith.constant 0.000000e+00 : f32
    %74 = vector.broadcast %cst_29 : f32 to vector<32x128xf32>
    %75 = tpu.concatenate %74, %71, %74 in 1 : vector<32x128xf32>, vector<32x128xf32>, vector<32x128xf32> -> vector<32x384xf32>
    %cst_30 = arith.constant 0.000000e+00 : f32
    %76 = vector.broadcast %cst_30 : f32 to vector<32x128xf32>
    %77 = vector.extract_strided_slice %75 {offsets = [0, 112], sizes = [32, 128], strides = [1, 1]} : vector<32x384xf32> to vector<32x128xf32>
    %78 = vector.extract_strided_slice %72 {offsets = [0, 0], sizes = [32, 1], strides = [1, 1]} : vector<32x5xf32> to vector<32x1xf32>
    %79 = vector.broadcast %78 : vector<32x1xf32> to vector<32x128xf32>
    %80 = arith.mulf %77, %79 : vector<32x128xf32>
    %81 = arith.addf %76, %80 : vector<32x128xf32>
    %82 = vector.extract_strided_slice %75 {offsets = [0, 120], sizes = [32, 128], strides = [1, 1]} : vector<32x384xf32> to vector<32x128xf32>
    %83 = vector.extract_strided_slice %72 {offsets = [0, 1], sizes = [32, 1], strides = [1, 1]} : vector<32x5xf32> to vector<32x1xf32>
    %84 = vector.broadcast %83 : vector<32x1xf32> to vector<32x128xf32>
    %85 = arith.mulf %82, %84 : vector<32x128xf32>
    %86 = arith.addf %81, %85 : vector<32x128xf32>
    %87 = vector.extract_strided_slice %75 {offsets = [0, 128], sizes = [32, 128], strides = [1, 1]} : vector<32x384xf32> to vector<32x128xf32>
    %88 = vector.extract_strided_slice %72 {offsets = [0, 2], sizes = [32, 1], strides = [1, 1]} : vector<32x5xf32> to vector<32x1xf32>
    %89 = vector.broadcast %88 : vector<32x1xf32> to vector<32x128xf32>
    %90 = arith.mulf %87, %89 : vector<32x128xf32>
    %91 = arith.addf %86, %90 : vector<32x128xf32>
    %92 = vector.extract_strided_slice %75 {offsets = [0, 136], sizes = [32, 128], strides = [1, 1]} : vector<32x384xf32> to vector<32x128xf32>
    %93 = vector.extract_strided_slice %72 {offsets = [0, 3], sizes = [32, 1], strides = [1, 1]} : vector<32x5xf32> to vector<32x1xf32>
    %94 = vector.broadcast %93 : vector<32x1xf32> to vector<32x128xf32>
    %95 = arith.mulf %92, %94 : vector<32x128xf32>
    %96 = arith.addf %91, %95 : vector<32x128xf32>
    %97 = vector.extract_strided_slice %75 {offsets = [0, 144], sizes = [32, 128], strides = [1, 1]} : vector<32x384xf32> to vector<32x128xf32>
    %98 = vector.extract_strided_slice %72 {offsets = [0, 4], sizes = [32, 1], strides = [1, 1]} : vector<32x5xf32> to vector<32x1xf32>
    %99 = vector.broadcast %98 : vector<32x1xf32> to vector<32x128xf32>
    %100 = arith.mulf %97, %99 : vector<32x128xf32>
    %101 = arith.addf %96, %100 : vector<32x128xf32>
    %102 = vector.broadcast %73 : vector<32x1xf32> to vector<32x128xf32>
    %103 = arith.addf %101, %102 : vector<32x128xf32>
    %104 = arith.negf %103 : vector<32x128xf32>
    %105 = math.exp %104 : vector<32x128xf32>
    %cst_31 = arith.constant 1.000000e+00 : f32
    %106 = vector.broadcast %cst_31 : f32 to vector<32x128xf32>
    %107 = arith.addf %106, %105 : vector<32x128xf32>
    %108 = arith.divf %106, %107 : vector<32x128xf32>
    %c0_32 = arith.constant 0 : index
    %c0_33 = arith.constant 0 : index
    %109 = vector.load %arg3[%c0_32, %c0_33] : memref<128x256xf32, #tpu.memory_space<vmem>>, vector<128x256xf32>
    %cst_34 = arith.constant dense<0.000000e+00> : vector<32x256xf32>
    %110 = tpu.matmul %108, %109, %cst_34 {dimension_numbers = #tpu.dot_dimension_numbers<[1], [0], [0], [1], [0, 0, 1, 1], [], []>} : vector<32x128xf32>, vector<128x256xf32>, vector<32x256xf32> -> vector<32x256xf32>
    %c0_35 = arith.constant 0 : index
    %c0_36 = arith.constant 0 : index
    %111 = vector.load %arg7[%c0_35, %c0_36] : memref<16x16xf32, #tpu.memory_space<vmem>>, vector<16x16xf32>
    %c0_37 = arith.constant 0 : index
    %c0_38 = arith.constant 0 : index
    %112 = vector.load %arg8[%c0_37, %c0_38] : memref<16x1xf32, #tpu.memory_space<vmem>>, vector<16x1xf32>
    %cst_39 = arith.constant dense<0.000000e+00> : vector<16x256xf32>
    %113 = tpu.matmul %111, %1, %cst_39 {dimension_numbers = #tpu.dot_dimension_numbers<[1], [0], [0], [1], [0, 0, 1, 1], [], []>} : vector<16x16xf32>, vector<16x256xf32>, vector<16x256xf32> -> vector<16x256xf32>
    %114 = vector.broadcast %112 : vector<16x1xf32> to vector<16x256xf32>
    %115 = arith.addf %113, %114 : vector<16x256xf32>
    %cst_40 = arith.constant 0.000000e+00 : f32
    %116 = vector.broadcast %cst_40 : f32 to vector<16x256xf32>
    %117 = arith.maximumf %115, %116 : vector<16x256xf32>
    %c0_41 = arith.constant 0 : index
    %c0_42 = arith.constant 0 : index
    %118 = vector.load %arg9[%c0_41, %c0_42] : memref<16x9xf32, #tpu.memory_space<vmem>>, vector<16x9xf32>
    %c0_43 = arith.constant 0 : index
    %c0_44 = arith.constant 0 : index
    %119 = vector.load %arg10[%c0_43, %c0_44] : memref<16x1xf32, #tpu.memory_space<vmem>>, vector<16x1xf32>
    %cst_45 = arith.constant 0.000000e+00 : f32
    %120 = vector.broadcast %cst_45 : f32 to vector<16x128xf32>
    %121 = tpu.concatenate %120, %117, %120 in 1 : vector<16x128xf32>, vector<16x256xf32>, vector<16x128xf32> -> vector<16x512xf32>
    %cst_46 = arith.constant 0.000000e+00 : f32
    %122 = vector.broadcast %cst_46 : f32 to vector<16x256xf32>
    %123 = vector.extract_strided_slice %121 {offsets = [0, 111], sizes = [16, 256], strides = [1, 1]} : vector<16x512xf32> to vector<16x256xf32>
    %c1_i32_47 = arith.constant 1 : i32
    %124 = vector.broadcast %c1_i32_47 : i32 to vector<1x256xi32>
    %125 = arith.cmpi sge, %2, %124 : vector<1x256xi32>
    %cst_48 = arith.constant 0.000000e+00 : f32
    %126 = vector.shape_cast %125 : vector<1x256xi1> to vector<1x256xi1>
    %127 = vector.broadcast %126 : vector<1x256xi1> to vector<16x256xi1>
    %128 = vector.broadcast %cst_48 : f32 to vector<16x256xf32>
    %129 = arith.select %127, %123, %128 : vector<16x256xi1>, vector<16x256xf32>
    %130 = vector.extract_strided_slice %118 {offsets = [0, 0], sizes = [16, 1], strides = [1, 1]} : vector<16x9xf32> to vector<16x1xf32>
    %131 = vector.broadcast %130 : vector<16x1xf32> to vector<16x256xf32>
    %132 = arith.mulf %129, %131 : vector<16x256xf32>
    %133 = arith.addf %122, %132 : vector<16x256xf32>
    %134 = vector.extract_strided_slice %121 {offsets = [0, 112], sizes = [16, 256], strides = [1, 1]} : vector<16x512xf32> to vector<16x256xf32>
    %135 = vector.extract_strided_slice %118 {offsets = [0, 1], sizes = [16, 1], strides = [1, 1]} : vector<16x9xf32> to vector<16x1xf32>
    %136 = vector.broadcast %135 : vector<16x1xf32> to vector<16x256xf32>
    %137 = arith.mulf %134, %136 : vector<16x256xf32>
    %138 = arith.addf %133, %137 : vector<16x256xf32>
    %139 = vector.extract_strided_slice %121 {offsets = [0, 113], sizes = [16, 256], strides = [1, 1]} : vector<16x512xf32> to vector<16x256xf32>
    %c15_i32 = arith.constant 15 : i32
    %140 = vector.broadcast %c15_i32 : i32 to vector<1x256xi32>
    %141 = arith.cmpi slt, %2, %140 : vector<1x256xi32>
    %cst_49 = arith.constant 0.000000e+00 : f32
    %142 = vector.shape_cast %141 : vector<1x256xi1> to vector<1x256xi1>
    %143 = vector.broadcast %142 : vector<1x256xi1> to vector<16x256xi1>
    %144 = vector.broadcast %cst_49 : f32 to vector<16x256xf32>
    %145 = arith.select %143, %139, %144 : vector<16x256xi1>, vector<16x256xf32>
    %146 = vector.extract_strided_slice %118 {offsets = [0, 2], sizes = [16, 1], strides = [1, 1]} : vector<16x9xf32> to vector<16x1xf32>
    %147 = vector.broadcast %146 : vector<16x1xf32> to vector<16x256xf32>
    %148 = arith.mulf %145, %147 : vector<16x256xf32>
    %149 = arith.addf %138, %148 : vector<16x256xf32>
    %150 = vector.extract_strided_slice %121 {offsets = [0, 127], sizes = [16, 256], strides = [1, 1]} : vector<16x512xf32> to vector<16x256xf32>
    %c1_i32_50 = arith.constant 1 : i32
    %151 = vector.broadcast %c1_i32_50 : i32 to vector<1x256xi32>
    %152 = arith.cmpi sge, %2, %151 : vector<1x256xi32>
    %cst_51 = arith.constant 0.000000e+00 : f32
    %153 = vector.shape_cast %152 : vector<1x256xi1> to vector<1x256xi1>
    %154 = vector.broadcast %153 : vector<1x256xi1> to vector<16x256xi1>
    %155 = vector.broadcast %cst_51 : f32 to vector<16x256xf32>
    %156 = arith.select %154, %150, %155 : vector<16x256xi1>, vector<16x256xf32>
    %157 = vector.extract_strided_slice %118 {offsets = [0, 3], sizes = [16, 1], strides = [1, 1]} : vector<16x9xf32> to vector<16x1xf32>
    %158 = vector.broadcast %157 : vector<16x1xf32> to vector<16x256xf32>
    %159 = arith.mulf %156, %158 : vector<16x256xf32>
    %160 = arith.addf %149, %159 : vector<16x256xf32>
    %161 = vector.extract_strided_slice %121 {offsets = [0, 128], sizes = [16, 256], strides = [1, 1]} : vector<16x512xf32> to vector<16x256xf32>
    %162 = vector.extract_strided_slice %118 {offsets = [0, 4], sizes = [16, 1], strides = [1, 1]} : vector<16x9xf32> to vector<16x1xf32>
    %163 = vector.broadcast %162 : vector<16x1xf32> to vector<16x256xf32>
    %164 = arith.mulf %161, %163 : vector<16x256xf32>
    %165 = arith.addf %160, %164 : vector<16x256xf32>
    %166 = vector.extract_strided_slice %121 {offsets = [0, 129], sizes = [16, 256], strides = [1, 1]} : vector<16x512xf32> to vector<16x256xf32>
    %c15_i32_52 = arith.constant 15 : i32
    %167 = vector.broadcast %c15_i32_52 : i32 to vector<1x256xi32>
    %168 = arith.cmpi slt, %2, %167 : vector<1x256xi32>
    %cst_53 = arith.constant 0.000000e+00 : f32
    %169 = vector.shape_cast %168 : vector<1x256xi1> to vector<1x256xi1>
    %170 = vector.broadcast %169 : vector<1x256xi1> to vector<16x256xi1>
    %171 = vector.broadcast %cst_53 : f32 to vector<16x256xf32>
    %172 = arith.select %170, %166, %171 : vector<16x256xi1>, vector<16x256xf32>
    %173 = vector.extract_strided_slice %118 {offsets = [0, 5], sizes = [16, 1], strides = [1, 1]} : vector<16x9xf32> to vector<16x1xf32>
    %174 = vector.broadcast %173 : vector<16x1xf32> to vector<16x256xf32>
    %175 = arith.mulf %172, %174 : vector<16x256xf32>
    %176 = arith.addf %165, %175 : vector<16x256xf32>
    %177 = vector.extract_strided_slice %121 {offsets = [0, 143], sizes = [16, 256], strides = [1, 1]} : vector<16x512xf32> to vector<16x256xf32>
    %c1_i32_54 = arith.constant 1 : i32
    %178 = vector.broadcast %c1_i32_54 : i32 to vector<1x256xi32>
    %179 = arith.cmpi sge, %2, %178 : vector<1x256xi32>
    %cst_55 = arith.constant 0.000000e+00 : f32
    %180 = vector.shape_cast %179 : vector<1x256xi1> to vector<1x256xi1>
    %181 = vector.broadcast %180 : vector<1x256xi1> to vector<16x256xi1>
    %182 = vector.broadcast %cst_55 : f32 to vector<16x256xf32>
    %183 = arith.select %181, %177, %182 : vector<16x256xi1>, vector<16x256xf32>
    %184 = vector.extract_strided_slice %118 {offsets = [0, 6], sizes = [16, 1], strides = [1, 1]} : vector<16x9xf32> to vector<16x1xf32>
    %185 = vector.broadcast %184 : vector<16x1xf32> to vector<16x256xf32>
    %186 = arith.mulf %183, %185 : vector<16x256xf32>
    %187 = arith.addf %176, %186 : vector<16x256xf32>
    %188 = vector.extract_strided_slice %121 {offsets = [0, 144], sizes = [16, 256], strides = [1, 1]} : vector<16x512xf32> to vector<16x256xf32>
    %189 = vector.extract_strided_slice %118 {offsets = [0, 7], sizes = [16, 1], strides = [1, 1]} : vector<16x9xf32> to vector<16x1xf32>
    %190 = vector.broadcast %189 : vector<16x1xf32> to vector<16x256xf32>
    %191 = arith.mulf %188, %190 : vector<16x256xf32>
    %192 = arith.addf %187, %191 : vector<16x256xf32>
    %193 = vector.extract_strided_slice %121 {offsets = [0, 145], sizes = [16, 256], strides = [1, 1]} : vector<16x512xf32> to vector<16x256xf32>
    %c15_i32_56 = arith.constant 15 : i32
    %194 = vector.broadcast %c15_i32_56 : i32 to vector<1x256xi32>
    %195 = arith.cmpi slt, %2, %194 : vector<1x256xi32>
    %cst_57 = arith.constant 0.000000e+00 : f32
    %196 = vector.shape_cast %195 : vector<1x256xi1> to vector<1x256xi1>
    %197 = vector.broadcast %196 : vector<1x256xi1> to vector<16x256xi1>
    %198 = vector.broadcast %cst_57 : f32 to vector<16x256xf32>
    %199 = arith.select %197, %193, %198 : vector<16x256xi1>, vector<16x256xf32>
    %200 = vector.extract_strided_slice %118 {offsets = [0, 8], sizes = [16, 1], strides = [1, 1]} : vector<16x9xf32> to vector<16x1xf32>
    %201 = vector.broadcast %200 : vector<16x1xf32> to vector<16x256xf32>
    %202 = arith.mulf %199, %201 : vector<16x256xf32>
    %203 = arith.addf %192, %202 : vector<16x256xf32>
    %204 = vector.broadcast %119 : vector<16x1xf32> to vector<16x256xf32>
    %205 = arith.addf %203, %204 : vector<16x256xf32>
    %cst_58 = arith.constant 0.000000e+00 : f32
    %206 = vector.broadcast %cst_58 : f32 to vector<16x256xf32>
    %207 = arith.maximumf %205, %206 : vector<16x256xf32>
    %208 = tpu.concatenate %117, %207 in 0 : vector<16x256xf32>, vector<16x256xf32> -> vector<32x256xf32>
    %209 = arith.mulf %208, %110 : vector<32x256xf32>
    %c0_59 = arith.constant 0 : index
    %c0_60 = arith.constant 0 : index
    %210 = vector.load %arg17[%c0_59, %c0_60] : memref<8x32xf32, #tpu.memory_space<vmem>>, vector<8x32xf32>
    %c0_61 = arith.constant 0 : index
    %c0_62 = arith.constant 0 : index
    %211 = vector.load %arg18[%c0_61, %c0_62] : memref<8x1xf32, #tpu.memory_space<vmem>>, vector<8x1xf32>
    %cst_63 = arith.constant dense<0.000000e+00> : vector<8x256xf32>
    %212 = tpu.matmul %210, %209, %cst_63 {dimension_numbers = #tpu.dot_dimension_numbers<[1], [0], [0], [1], [0, 0, 1, 1], [], []>} : vector<8x32xf32>, vector<32x256xf32>, vector<8x256xf32> -> vector<8x256xf32>
    %213 = vector.broadcast %211 : vector<8x1xf32> to vector<8x256xf32>
    %214 = arith.addf %212, %213 : vector<8x256xf32>
    %c0_64 = arith.constant 0 : index
    %c0_65 = arith.constant 0 : index
    %215 = vector.load %arg19[%c0_64, %c0_65] : memref<8x9xf32, #tpu.memory_space<vmem>>, vector<8x9xf32>
    %c0_66 = arith.constant 0 : index
    %c0_67 = arith.constant 0 : index
    %216 = vector.load %arg20[%c0_66, %c0_67] : memref<8x1xf32, #tpu.memory_space<vmem>>, vector<8x1xf32>
    %cst_68 = arith.constant 0.000000e+00 : f32
    %217 = vector.broadcast %cst_68 : f32 to vector<8x128xf32>
    %218 = tpu.concatenate %217, %214, %217 in 1 : vector<8x128xf32>, vector<8x256xf32>, vector<8x128xf32> -> vector<8x512xf32>
    %cst_69 = arith.constant 0.000000e+00 : f32
    %219 = vector.broadcast %cst_69 : f32 to vector<8x256xf32>
    %220 = vector.extract_strided_slice %218 {offsets = [0, 111], sizes = [8, 256], strides = [1, 1]} : vector<8x512xf32> to vector<8x256xf32>
    %c1_i32_70 = arith.constant 1 : i32
    %221 = vector.broadcast %c1_i32_70 : i32 to vector<1x256xi32>
    %222 = arith.cmpi sge, %2, %221 : vector<1x256xi32>
    %cst_71 = arith.constant 0.000000e+00 : f32
    %223 = vector.shape_cast %222 : vector<1x256xi1> to vector<1x256xi1>
    %224 = vector.broadcast %223 : vector<1x256xi1> to vector<8x256xi1>
    %225 = vector.broadcast %cst_71 : f32 to vector<8x256xf32>
    %226 = arith.select %224, %220, %225 : vector<8x256xi1>, vector<8x256xf32>
    %227 = vector.extract_strided_slice %215 {offsets = [0, 0], sizes = [8, 1], strides = [1, 1]} : vector<8x9xf32> to vector<8x1xf32>
    %228 = vector.broadcast %227 : vector<8x1xf32> to vector<8x256xf32>
    %229 = arith.mulf %226, %228 : vector<8x256xf32>
    %230 = arith.addf %219, %229 : vector<8x256xf32>
    %231 = vector.extract_strided_slice %218 {offsets = [0, 112], sizes = [8, 256], strides = [1, 1]} : vector<8x512xf32> to vector<8x256xf32>
    %232 = vector.extract_strided_slice %215 {offsets = [0, 1], sizes = [8, 1], strides = [1, 1]} : vector<8x9xf32> to vector<8x1xf32>
    %233 = vector.broadcast %232 : vector<8x1xf32> to vector<8x256xf32>
    %234 = arith.mulf %231, %233 : vector<8x256xf32>
    %235 = arith.addf %230, %234 : vector<8x256xf32>
    %236 = vector.extract_strided_slice %218 {offsets = [0, 113], sizes = [8, 256], strides = [1, 1]} : vector<8x512xf32> to vector<8x256xf32>
    %c15_i32_72 = arith.constant 15 : i32
    %237 = vector.broadcast %c15_i32_72 : i32 to vector<1x256xi32>
    %238 = arith.cmpi slt, %2, %237 : vector<1x256xi32>
    %cst_73 = arith.constant 0.000000e+00 : f32
    %239 = vector.shape_cast %238 : vector<1x256xi1> to vector<1x256xi1>
    %240 = vector.broadcast %239 : vector<1x256xi1> to vector<8x256xi1>
    %241 = vector.broadcast %cst_73 : f32 to vector<8x256xf32>
    %242 = arith.select %240, %236, %241 : vector<8x256xi1>, vector<8x256xf32>
    %243 = vector.extract_strided_slice %215 {offsets = [0, 2], sizes = [8, 1], strides = [1, 1]} : vector<8x9xf32> to vector<8x1xf32>
    %244 = vector.broadcast %243 : vector<8x1xf32> to vector<8x256xf32>
    %245 = arith.mulf %242, %244 : vector<8x256xf32>
    %246 = arith.addf %235, %245 : vector<8x256xf32>
    %247 = vector.extract_strided_slice %218 {offsets = [0, 127], sizes = [8, 256], strides = [1, 1]} : vector<8x512xf32> to vector<8x256xf32>
    %c1_i32_74 = arith.constant 1 : i32
    %248 = vector.broadcast %c1_i32_74 : i32 to vector<1x256xi32>
    %249 = arith.cmpi sge, %2, %248 : vector<1x256xi32>
    %cst_75 = arith.constant 0.000000e+00 : f32
    %250 = vector.shape_cast %249 : vector<1x256xi1> to vector<1x256xi1>
    %251 = vector.broadcast %250 : vector<1x256xi1> to vector<8x256xi1>
    %252 = vector.broadcast %cst_75 : f32 to vector<8x256xf32>
    %253 = arith.select %251, %247, %252 : vector<8x256xi1>, vector<8x256xf32>
    %254 = vector.extract_strided_slice %215 {offsets = [0, 3], sizes = [8, 1], strides = [1, 1]} : vector<8x9xf32> to vector<8x1xf32>
    %255 = vector.broadcast %254 : vector<8x1xf32> to vector<8x256xf32>
    %256 = arith.mulf %253, %255 : vector<8x256xf32>
    %257 = arith.addf %246, %256 : vector<8x256xf32>
    %258 = vector.extract_strided_slice %218 {offsets = [0, 128], sizes = [8, 256], strides = [1, 1]} : vector<8x512xf32> to vector<8x256xf32>
    %259 = vector.extract_strided_slice %215 {offsets = [0, 4], sizes = [8, 1], strides = [1, 1]} : vector<8x9xf32> to vector<8x1xf32>
    %260 = vector.broadcast %259 : vector<8x1xf32> to vector<8x256xf32>
    %261 = arith.mulf %258, %260 : vector<8x256xf32>
    %262 = arith.addf %257, %261 : vector<8x256xf32>
    %263 = vector.extract_strided_slice %218 {offsets = [0, 129], sizes = [8, 256], strides = [1, 1]} : vector<8x512xf32> to vector<8x256xf32>
    %c15_i32_76 = arith.constant 15 : i32
    %264 = vector.broadcast %c15_i32_76 : i32 to vector<1x256xi32>
    %265 = arith.cmpi slt, %2, %264 : vector<1x256xi32>
    %cst_77 = arith.constant 0.000000e+00 : f32
    %266 = vector.shape_cast %265 : vector<1x256xi1> to vector<1x256xi1>
    %267 = vector.broadcast %266 : vector<1x256xi1> to vector<8x256xi1>
    %268 = vector.broadcast %cst_77 : f32 to vector<8x256xf32>
    %269 = arith.select %267, %263, %268 : vector<8x256xi1>, vector<8x256xf32>
    %270 = vector.extract_strided_slice %215 {offsets = [0, 5], sizes = [8, 1], strides = [1, 1]} : vector<8x9xf32> to vector<8x1xf32>
    %271 = vector.broadcast %270 : vector<8x1xf32> to vector<8x256xf32>
    %272 = arith.mulf %269, %271 : vector<8x256xf32>
    %273 = arith.addf %262, %272 : vector<8x256xf32>
    %274 = vector.extract_strided_slice %218 {offsets = [0, 143], sizes = [8, 256], strides = [1, 1]} : vector<8x512xf32> to vector<8x256xf32>
    %c1_i32_78 = arith.constant 1 : i32
    %275 = vector.broadcast %c1_i32_78 : i32 to vector<1x256xi32>
    %276 = arith.cmpi sge, %2, %275 : vector<1x256xi32>
    %cst_79 = arith.constant 0.000000e+00 : f32
    %277 = vector.shape_cast %276 : vector<1x256xi1> to vector<1x256xi1>
    %278 = vector.broadcast %277 : vector<1x256xi1> to vector<8x256xi1>
    %279 = vector.broadcast %cst_79 : f32 to vector<8x256xf32>
    %280 = arith.select %278, %274, %279 : vector<8x256xi1>, vector<8x256xf32>
    %281 = vector.extract_strided_slice %215 {offsets = [0, 6], sizes = [8, 1], strides = [1, 1]} : vector<8x9xf32> to vector<8x1xf32>
    %282 = vector.broadcast %281 : vector<8x1xf32> to vector<8x256xf32>
    %283 = arith.mulf %280, %282 : vector<8x256xf32>
    %284 = arith.addf %273, %283 : vector<8x256xf32>
    %285 = vector.extract_strided_slice %218 {offsets = [0, 144], sizes = [8, 256], strides = [1, 1]} : vector<8x512xf32> to vector<8x256xf32>
    %286 = vector.extract_strided_slice %215 {offsets = [0, 7], sizes = [8, 1], strides = [1, 1]} : vector<8x9xf32> to vector<8x1xf32>
    %287 = vector.broadcast %286 : vector<8x1xf32> to vector<8x256xf32>
    %288 = arith.mulf %285, %287 : vector<8x256xf32>
    %289 = arith.addf %284, %288 : vector<8x256xf32>
    %290 = vector.extract_strided_slice %218 {offsets = [0, 145], sizes = [8, 256], strides = [1, 1]} : vector<8x512xf32> to vector<8x256xf32>
    %c15_i32_80 = arith.constant 15 : i32
    %291 = vector.broadcast %c15_i32_80 : i32 to vector<1x256xi32>
    %292 = arith.cmpi slt, %2, %291 : vector<1x256xi32>
    %cst_81 = arith.constant 0.000000e+00 : f32
    %293 = vector.shape_cast %292 : vector<1x256xi1> to vector<1x256xi1>
    %294 = vector.broadcast %293 : vector<1x256xi1> to vector<8x256xi1>
    %295 = vector.broadcast %cst_81 : f32 to vector<8x256xf32>
    %296 = arith.select %294, %290, %295 : vector<8x256xi1>, vector<8x256xf32>
    %297 = vector.extract_strided_slice %215 {offsets = [0, 8], sizes = [8, 1], strides = [1, 1]} : vector<8x9xf32> to vector<8x1xf32>
    %298 = vector.broadcast %297 : vector<8x1xf32> to vector<8x256xf32>
    %299 = arith.mulf %296, %298 : vector<8x256xf32>
    %300 = arith.addf %289, %299 : vector<8x256xf32>
    %301 = vector.broadcast %216 : vector<8x1xf32> to vector<8x256xf32>
    %302 = arith.addf %300, %301 : vector<8x256xf32>
    %303 = tpu.concatenate %214, %302 in 0 : vector<8x256xf32>, vector<8x256xf32> -> vector<16x256xf32>
    %304 = arith.addf %303, %1 : vector<16x256xf32>
    %c0_82 = arith.constant 0 : index
    %c0_83 = arith.constant 0 : index
    %c0_84 = arith.constant 0 : index
    %305 = vector.load %arg21[%c0_82, %c0_83, %c0_84] : memref<1x16x256xf32, #tpu.memory_space<vmem>>, vector<1x16x256xf32>
    %306 = vector.shape_cast %305 : vector<1x16x256xf32> to vector<16x256xf32>
    %307 = vector.shape_cast %304 : vector<16x256xf32> to vector<1x16x256xf32>
    tpu.vector_store %arg21[%c0_82, %c0_83, %c0_84], %307 {strides = array<i32>} : memref<1x16x256xf32, #tpu.memory_space<vmem>>, vector<1x16x256xf32>,
    return
  }
  func.func @transform_0(%arg0: i32) -> (i32, i32, i32) {
    %c0_i32 = arith.constant 0 : i32
    %c0_i32_0 = arith.constant 0 : i32
    %c0_i32_1 = arith.constant 0 : i32
    return %arg0, %c0_i32, %c0_i32_0 : i32, i32, i32
  }
  func.func @transform_1(%arg0: i32) -> (i32, i32) {
    %c0_i32 = arith.constant 0 : i32
    %c0_i32_0 = arith.constant 0 : i32
    %c0_i32_1 = arith.constant 0 : i32
    return %c0_i32, %c0_i32_0 : i32, i32
  }
  func.func @transform_2(%arg0: i32) -> (i32, i32) {
    %c0_i32 = arith.constant 0 : i32
    %c0_i32_0 = arith.constant 0 : i32
    %c0_i32_1 = arith.constant 0 : i32
    return %c0_i32, %c0_i32_0 : i32, i32
  }
  func.func @transform_3(%arg0: i32) -> (i32, i32) {
    %c0_i32 = arith.constant 0 : i32
    %c0_i32_0 = arith.constant 0 : i32
    %c0_i32_1 = arith.constant 0 : i32
    return %c0_i32, %c0_i32_0 : i32, i32
  }
  func.func @transform_4(%arg0: i32) -> (i32, i32) {
    %c0_i32 = arith.constant 0 : i32
    %c0_i32_0 = arith.constant 0 : i32
    %c0_i32_1 = arith.constant 0 : i32
    return %c0_i32, %c0_i32_0 : i32, i32
  }
  func.func @transform_5(%arg0: i32) -> (i32, i32) {
    %c0_i32 = arith.constant 0 : i32
    %c0_i32_0 = arith.constant 0 : i32
    %c0_i32_1 = arith.constant 0 : i32
    return %c0_i32, %c0_i32_0 : i32, i32
  }
  func.func @transform_6(%arg0: i32) -> (i32, i32) {
    %c0_i32 = arith.constant 0 : i32
    %c0_i32_0 = arith.constant 0 : i32
    %c0_i32_1 = arith.constant 0 : i32
    return %c0_i32, %c0_i32_0 : i32, i32
  }
  func.func @transform_7(%arg0: i32) -> (i32, i32) {
    %c0_i32 = arith.constant 0 : i32
    %c0_i32_0 = arith.constant 0 : i32
    %c0_i32_1 = arith.constant 0 : i32
    return %c0_i32, %c0_i32_0 : i32, i32
  }
  func.func @transform_8(%arg0: i32) -> (i32, i32) {
    %c0_i32 = arith.constant 0 : i32
    %c0_i32_0 = arith.constant 0 : i32
    %c0_i32_1 = arith.constant 0 : i32
    return %c0_i32, %c0_i32_0 : i32, i32
  }
  func.func @transform_9(%arg0: i32) -> (i32, i32) {
    %c0_i32 = arith.constant 0 : i32
    %c0_i32_0 = arith.constant 0 : i32
    %c0_i32_1 = arith.constant 0 : i32
    return %c0_i32, %c0_i32_0 : i32, i32
  }
  func.func @transform_10(%arg0: i32) -> (i32, i32) {
    %c0_i32 = arith.constant 0 : i32
    %c0_i32_0 = arith.constant 0 : i32
    %c0_i32_1 = arith.constant 0 : i32
    return %c0_i32, %c0_i32_0 : i32, i32
  }
  func.func @transform_11(%arg0: i32) -> (i32, i32) {
    %c0_i32 = arith.constant 0 : i32
    %c0_i32_0 = arith.constant 0 : i32
    %c0_i32_1 = arith.constant 0 : i32
    return %c0_i32, %c0_i32_0 : i32, i32
  }
  func.func @transform_12(%arg0: i32) -> (i32, i32) {
    %c0_i32 = arith.constant 0 : i32
    %c0_i32_0 = arith.constant 0 : i32
    %c0_i32_1 = arith.constant 0 : i32
    return %c0_i32, %c0_i32_0 : i32, i32
  }
  func.func @transform_13(%arg0: i32) -> (i32, i32) {
    %c0_i32 = arith.constant 0 : i32
    %c0_i32_0 = arith.constant 0 : i32
    %c0_i32_1 = arith.constant 0 : i32
    return %c0_i32, %c0_i32_0 : i32, i32
  }
  func.func @transform_14(%arg0: i32) -> (i32, i32) {
    %c0_i32 = arith.constant 0 : i32
    %c0_i32_0 = arith.constant 0 : i32
    %c0_i32_1 = arith.constant 0 : i32
    return %c0_i32, %c0_i32_0 : i32, i32
  }
  func.func @transform_15(%arg0: i32) -> (i32, i32) {
    %c0_i32 = arith.constant 0 : i32
    %c0_i32_0 = arith.constant 0 : i32
    %c0_i32_1 = arith.constant 0 : i32
    return %c0_i32, %c0_i32_0 : i32, i32
  }
  func.func @transform_16(%arg0: i32) -> (i32, i32) {
    %c0_i32 = arith.constant 0 : i32
    %c0_i32_0 = arith.constant 0 : i32
    %c0_i32_1 = arith.constant 0 : i32
    return %c0_i32, %c0_i32_0 : i32, i32
  }
  func.func @transform_17(%arg0: i32) -> (i32, i32) {
    %c0_i32 = arith.constant 0 : i32
    %c0_i32_0 = arith.constant 0 : i32
    %c0_i32_1 = arith.constant 0 : i32
    return %c0_i32, %c0_i32_0 : i32, i32
  }
  func.func @transform_18(%arg0: i32) -> (i32, i32) {
    %c0_i32 = arith.constant 0 : i32
    %c0_i32_0 = arith.constant 0 : i32
    %c0_i32_1 = arith.constant 0 : i32
    return %c0_i32, %c0_i32_0 : i32, i32
  }
  func.func @transform_19(%arg0: i32) -> (i32, i32) {
    %c0_i32 = arith.constant 0 : i32
    %c0_i32_0 = arith.constant 0 : i32
    %c0_i32_1 = arith.constant 0 : i32
    return %c0_i32, %c0_i32_0 : i32, i32
  }
  func.func @transform_20(%arg0: i32) -> (i32, i32, i32) {
    %c0_i32 = arith.constant 0 : i32
    %c0_i32_0 = arith.constant 0 : i32
    %c0_i32_1 = arith.constant 0 : i32
    return %arg0, %c0_i32, %c0_i32_0 : i32, i32, i32
  }
}

</mosaic_0001>

<bundles_post_ra>
// kernel: tpu_custom_call.1
= control target key start
LH: loop header
LB: loop body
LE: loop exit
PB: predicated region body
PF: predicated region fallthrough
CT: control target
= control target key end

     0   :  { %s4242_s0 = inlined_call_operand.vmem [shape: f32[2,16,256], index: 0, kind: input, shape index: {}]   ;;  %s4243_s1 = inlined_call_operand.hbm [shape: f32[256,128], index: 1, kind: input, shape index: {}]   ;;  %s4244_s2 = inlined_call_operand.hbm [shape: f32[128,256], index: 2, kind: input, shape index: {}]   ;;  %s4245_s3 = inlined_call_operand.vmem [shape: s32[1,256], index: 3, kind: input, shape index: {}]   ;;  %s4246_s4 = inlined_call_operand.vmem [shape: s32[1,128], index: 4, kind: input, shape index: {}]   ;;  %s4247_s5 = inlined_call_operand.vmem [shape: f32[1,128], index: 5, kind: input, shape index: {}]   ;;  %s4248_s6 = inlined_call_operand.vmem [shape: f32[16,16], index: 6, kind: input, shape index: {}]   ;;  %s4249_s7 = inlined_call_operand.vmem [shape: f32[16,1], index: 7, kind: input, shape index: {}]   ;;  %s4250_s8 = inlined_call_operand.vmem [shape: f32[16,9], index: 8, kind: input, shape index: {}]   ;;  %s4251_s9 = inlined_call_operand.vmem [shape: f32[16,1], index: 9, kind: input, shape index: {}]   ;;  %s4252_s10 = inlined_call_operand.vmem [shape: f32[32,16], index: 10, kind: input, shape index: {}]   ;;  %s4253_s11 = inlined_call_operand.vmem [shape: f32[32,1], index: 11, kind: input, shape index: {}]   ;;  %s4254_s12 = inlined_call_operand.vmem [shape: f32[32,5], index: 12, kind: input, shape index: {}]   ;;  %s4255_s13 = inlined_call_operand.vmem [shape: f32[32,1], index: 13, kind: input, shape index: {}]   ;;  %s4256_s14 = inlined_call_operand.vmem [shape: f32[32,5], index: 14, kind: input, shape index: {}]   ;;  %s4257_s15 = inlined_call_operand.vmem [shape: f32[32,1], index: 15, kind: input, shape index: {}]   ;;  %s4258_s16 = inlined_call_operand.vmem [shape: f32[8,32], index: 16, kind: input, shape index: {}]   ;;  %s4259_s17 = inlined_call_operand.vmem [shape: f32[8,1], index: 17, kind: input, shape index: {}]   ;;  %s4260_s18 = inlined_call_operand.vmem [shape: f32[8,9], index: 18, kind: input, shape index: {}]   ;;  %s4261_s19 = inlined_call_operand.vmem [shape: f32[8,1], index: 19, kind: input, shape index: {}]   ;;  %s4262_s20 = inlined_call_operand.hbm [shape: f32[2,16,256], index: 20, kind: output, shape index: {}]  }
   0x1   :  { %4290 = sst [smem:[#allocation26_spill]] %s4242_s0 }
   0x2   :  { %4291 = sst [smem:[#allocation27_spill]] %s4243_s1 }
   0x3   :  { %4292 = sst [smem:[#allocation28_spill]] %s4244_s2 }
   0x4   :  { %4293 = sst [smem:[#allocation29_spill]] %s4245_s3 }
   0x5   :  { %4294 = sst [smem:[#allocation30_spill]] %s4246_s4 }
   0x6   :  { %4295 = sst [smem:[#allocation31_spill]] %s4247_s5 }
   0x7   :  { %4296 = sst [smem:[#allocation32_spill]] %s4248_s6 }
   0x8   :  { %4297 = sst [smem:[#allocation33_spill]] %s4262_s20 }
   0x9   :  { %25 = vsyncpa [#allocation3], 0 }
   0xa   :  { %26 = vsyncpa [#allocation6], 0 }
   0xb   :  { %27 = vsyncpa [#allocation4], 0 }
   0xc   :  { %29 = vsyncpa [#allocation4 + $0x1], 0  ;;  %s2979_s1 = smov 0   ;;  %s2981_s22 = smov 0  }
   0xd   :  { %s2983_s23 = smov 0   ;;  %s2985_s24 = smov 0  }
   0xe LB: > { %4298 = sst [smem:[#allocation11_spill]] %s2830_s1  ;;  %s3000_s2 = sadd.s32 4294967295, %s2842_s24   ;;  %s2842_s24 = sphi %s2985_s24, %s4370_s24   ;;  %s2838_s23 = sphi %s2983_s23, %s4372_s23   ;;  %s2834_s22 = sphi %s2981_s22, %s4374_s22   ;;  %s2830_s1 = sphi %s2979_s1, %s4373_s1  }
   0xf   : > { %4299 = sst [smem:[#allocation12_spill]] %s2838_s23  ;;  %s2476_s25 = sadd.s32 4294967294, %s2842_s24  }
  0x10   : > { %4300 = sst [smem:[#allocation13_spill]] %s2842_s24  ;;  %s3004_s3 = sadd.s32 1, %s2842_s24  }
  0x11   : > { %4301 = sst [smem:[#allocation14_spill]] %s3004_s3  ;;  %s467_s26 = sadd.s32 1, %s2838_s23 }
  0x12   : > { %s464_s27 = ssub.s32 %s2842_s24, %s3004_s3  ;;  %p477_p0 = scmp.ne.s32.totalorder %s2838_s23, %s2834_s22 }
  0x13   : > { %p465_p1 = scmp.eq.s32.totalorder %s464_s27, 0  ;;  %p478_p2 = scmp.eq.s32.totalorder %s3000_s2, 1 }
  0x14   : > { %p483_p3 = scmp.ne.s32.totalorder %s2834_s22, %s2830_s1  ;;  %p484_p4 = scmp.eq.s32.totalorder %s2476_s25, 1 }
  0x15   : > { %s3015_s28 = scalar_select %p465_p1, %s2838_s23, %s467_s26  }
  0x16   : > { %p3017_p5 = por %p478_p2, %p477_p0  ;;  %p3021_p6 = por %p484_p4, %p483_p3 }
  0x17   : > { %4302 = sst [smem:[#allocation15_spill]] %s3015_s28  ;;  %p2477_p7 = scmp.ge.s32.totalorder %s2842_s24, 1 }
  0x18   : > { %s4303_s4 = scalar_select %p3017_p5, 1, 0 }
  0x19   : > { %s4305_s29 = scalar_select %p3021_p6, 1, 0 }
  0x1a   : > { %4304 = sst [smem:[#allocation16_spill]] %s4303_s4  ;;  %p491_p8 = scmp.lt.s32.totalorder %s2842_s24, 3 }
  0x1b   : > { %4306 = sst [smem:[#allocation17_spill]] %s4305_s29  ;;  %p2533_p9 = scmp.eq.s32.totalorder %s3000_s2, 0 }
  0x1c   : > { %p3028_p10 = pnand %p2477_p7, %p491_p8  ;;  %s4308_s25 = sld [smem:[#allocation27_spill]] }
  0x1d   : > { %s2844_s27 = smov [#allocation2]   ;;  %s4309_s29 = sld [smem:[#allocation28_spill]] }
  0x1e   : > { %p2522_p11 = pneg %p3028_p10  ;;  %s504_s28 = sshll.u32 %s2844_s27, 4  ;;  %s505_s28 = int_to_ptr.vmem [resolvable:$true] %s504_s28 }
  0x1f   : > { %s2845_s24 = smov 128   ;;  %s2846_s4 = smov 8  }
  0x20   : > { %p2523_p12 = pnand %p2533_p9, %p2522_p11  ;;  %s2847_s20 = smov [#allocation5]  }
  0x21   : > { %s518_s0 = sshll.u32 %s2847_s20, 4  ;;  %s2848_s21 = smov 256   ;;  %s519_s0 = int_to_ptr.vmem [resolvable:$true] %s518_s0 }
  0x22   : > { %s502_s26 = sshll.u32 %s4308_s25, 4  ;;  %s2849_s25 = smov 16   ;;  %s503_s26 = int_to_ptr.hbm [resolvable:$true] %s502_s26 }
  0x23   : > { %s516_s1 = sshll.u32 %s4309_s29, 4  ;;  %593 = sbr.rel (%p3028_p10) target bundleno = 1450 (0x5aa), region = 100  ;;  %s517_s1 = int_to_ptr.hbm [resolvable:$true] %s516_s1 }
  0x24   : > { %2525 = dma.hbm_to_vmem [thread:$0]  (!%p2523_p12), %s503_s26, 4096, %s505_s28, [#allocation3], %s2845_s24, %s2845_s24, %s2846_s4  }
  0x25   : > { %2528 = dma.hbm_to_vmem [thread:$0]  (!%p2523_p12), %s517_s1, 4096, %s519_s0, [#allocation6], %s2848_s21, %s2848_s21, %s2849_s25  }
  0x28   : > { %2817 = dma.done.wait (%p2533_p9), [#allocation3], 4096  }
  0x29   : > { %2819 = vsyncadd (%p2533_p9), [#allocation3], 4294963200 }
  0x2a   : > { %2821 = dma.done.wait (%p2533_p9), [#allocation6], 4096  }
  0x2b   : > { %2823 = vsyncadd (%p2533_p9), [#allocation6], 4294963200  ;;  %v4282_v0 = vmov 0   ;;  %v4280_v1 = vmov 0.0   ;;  %s2852_s20 = smov 2   ;;  %v753_v2 = vld [vmem:[%s4253_s11 + $0x10] sm:$0xff] }
  0x2c   : > { %2601 = vset.pattern.permute.xlu1 %v4282_v0  ;;  %2602 = vset.pattern.permute.xlu2 %v4282_v0  ;;  %v684_v3 = vld [vmem:[#allocation2 + $0x78] sm:$0xff]  ;;  %v683_v5 = vld [vmem:[#allocation2 + $0x70] sm:$0xff]  ;;  %v682_v7 = vld [vmem:[#allocation2 + $0x68] sm:$0xff]  ;;  %p657_p13 = scmp.lt.s32.totalorder %s3000_s2, 1  ;;  %s2853_s0 = smov 1   ;;  %v4278_v35 = vmov 1  }
  0x2d   : > { %841 = vrot.lane.b32.xlu2 %v4280_v1, %s2852_s20  ;;  %2600 = vset.pattern.permute.xlu0 %v4282_v0  ;;  %v700_v4 = vld [vmem:[#allocation2 + $0xf8] sm:$0xff]  ;;  %v699_v6 = vld [vmem:[#allocation2 + $0xf0] sm:$0xff]  ;;  %v698_v8 = vld [vmem:[#allocation2 + $0xe8] sm:$0xff]  ;;  %s4310_s1 = sld [smem:[#allocation26_spill]]  ;;  %v4276_v43 = vmov 2   ;;  %v4274_v48 = vmov 3  }
  0x2e   : > { %767 = vperm.xlu1 %2601, %v753_v2   ;;  %701 = vmatpush.msra.mxu0 %v684_v3  ;;  %v681_v9 = vld [vmem:[#allocation2 + $0x60] sm:$0xff]  ;;  %v754_v11 = vld [vmem:[%s4253_s11 + $0x18] sm:$0xff]  ;;  %v679_v14 = vld [vmem:[#allocation2 + $0x50] sm:$0xff]  ;;  %s658_s26 = scalar_select %p657_p13, %s3000_s2, 1  ;;  %v4272_v49 = vmov 4   ;;  %vm775_vm0 = vcmask 130048  }
  0x2f   : > { %724 = vmatpush.msra.mxu1 %v700_v4  ;;  %v697_v10 = vld [vmem:[#allocation2 + $0xe0] sm:$0xff]  ;;  %v680_v12 = vld [vmem:[#allocation2 + $0x58] sm:$0xff]  ;;  %v695_v15 = vld [vmem:[#allocation2 + $0xd0] sm:$0xff]  ;;  %s2857_s21 = smov 127   ;;  %s2858_s25 = smov 126   ;;  %vm906_vm3 = vcmask 7168  }
  0x30   : > { %702 = vmatpush.msra.mxu0 %v683_v5  ;;  %v696_v13 = vld [vmem:[#allocation2 + $0xd8] sm:$0xff]  ;;  %v678_v16 = vld [vmem:[#allocation2 + $0x48] sm:$0xff]  ;;  %v677_v18 = vld [vmem:[#allocation2 + $0x40] sm:$0xff]  ;;  %s2510_s27 = sshll.u32 %s658_s26, 5  ;;  %s2860_s4 = smov 120   ;;  %vm851_vm4 = vcmask 15360  }
  0x31   : > { %725 = vmatpush.msra.mxu1 %v699_v6  ;;  %v694_v17 = vld [vmem:[#allocation2 + $0xc8] sm:$0xff]  ;;  %v693_v19 = vld [vmem:[#allocation2 + $0xc0] sm:$0xff]  ;;  %v676_v21 = vld [vmem:[#allocation2 + $0x38] sm:$0xff]  ;;  %s4315_s5 = sld [smem:[#allocation31_spill]]  ;;  %s2861_s29 = smov 104   ;;  %vm1032_vm9 = vcmask 1031168  }
  0x32   : > { %703 = vmatpush.msra.mxu0 %v682_v7  ;;  %v3066_v20 = vld [vmem:[%s4254_s12 + $0x8] sm:$0xff]  ;;  %v692_v22 = vld [vmem:[#allocation2 + $0xb8] sm:$0xff]  ;;  %v675_v23 = vld [vmem:[#allocation2 + $0x30] sm:$0xff]  ;;  %s2862_s30 = smov 96   ;;  %vm981_vm10 = vcmask 1039360   ;;  %s4330_s6 = sld [smem:[#allocation32_spill]] }
  0x33   : > { %726 = vmatpush.msra.mxu1 %v698_v8  ;;  %v691_v24 = vld [vmem:[#allocation2 + $0xb0] sm:$0xff]  ;;  %v674_v26 = vld [vmem:[#allocation2 + $0x28] sm:$0xff]  ;;  %v673_v28 = vld [vmem:[#allocation2 + $0x20] sm:$0xff]  ;;  %s3083_s23 = scalar_lea.vmem %s4310_s1, %s2510_s27  ;;  %s4320_s1 = sld [smem:[#allocation30_spill]]  ;;  %vm1189_vm13 = vcmask 982016   ;;  %vm1302_vm14 = vcmask 850944  }
  0x34   : > { %704 = vmatpush.msra.mxu0 %v681_v9  ;;  %v3073_v25 = vld [vmem:[%s4254_s12 + $0x10] sm:$0xff]  ;;  %v690_v27 = vld [vmem:[#allocation2 + $0xa8] sm:$0xff]  ;;  %v689_v29 = vld [vmem:[#allocation2 + $0xa0] sm:$0xff]  ;;  %s2864_s28 = smov 17   ;;  %vm1371_vm15 = vcmask 785408   ;;  %s4289_s27 = smov 16  }
  0x35   : > { %727 = vmatpush.msra.mxu1 %v697_v10  ;;  %876 = vperm.xlu2 %2602, %v3073_v25   ;;  %v672_v30 = vld [vmem:[#allocation2 + $0x18] sm:$0xff]  ;;  %v671_v32 = vld [vmem:[#allocation2 + $0x10] sm:$0xff]  ;;  %v670_v34 = vld [vmem:[#allocation2 + $0x8] sm:$0xff]  ;;  %s2867_s26 = smov 15  }
  0x36   : > { %772 = vperm.xlu1 %2601, %v754_v11   ;;  %705 = vmatpush.msra.mxu0 %v680_v12  ;;  %v688_v31 = vld [vmem:[#allocation2 + $0x98] sm:$0xff]  ;;  %v687_v33 = vld [vmem:[#allocation2 + $0x90] sm:$0xff]  ;;  %v686_v36 = vld [vmem:[#allocation2 + $0x88] sm:$0xff] }
  0x37   : > { %728 = vmatpush.msra.mxu1 %v696_v13  ;;  %v669_v37 = vld [vmem:[#allocation2] sm:$0xff]  ;;  %v663_v40 = vld [vmem:[%s3083_s23 + $0x8] sm:$0xff]  ;;  %v664_v41 = vld [vmem:[%s3083_s23 + $0x10] sm:$0xff] }
  0x38   : > { %706 = vmatpush.msra.mxu0 %v679_v14  ;;  %v685_v38 = vld [vmem:[#allocation2 + $0x80] sm:$0xff]  ;;  %v665_v42 = vld [vmem:[%s3083_s23 + $0x18] sm:$0xff]  ;;  %v752_v47 = vld [vmem:[%s4253_s11 + $0x8] sm:$0xff] }
  0x39   : > { %729 = vmatpush.msra.mxu1 %v695_v15  ;;  %v662_v39 = vld [vmem:[%s3083_s23] sm:$0xff]  ;;  %v3096_v44 = vld [vmem:[%s4254_s12 + $0x18] sm:$0xff]  ;;  %v829_v51 = vld [vmem:[%s4255_s13 + $0x8] sm:$0xff] }
  0x3a   : > { %707 = vmatpush.msra.mxu0 %v678_v16  ;;  %v3102_v45 = vld [vmem:[%s4254_s12] sm:$0xff]  ;;  %v3149_v53 = vld [vmem:[%s4256_s14 + $0x10] sm:$0xff]  ;;  %v3161_v55 = vld [vmem:[%s4256_s14 + $0x8] sm:$0xff] }
  0x3b   : > { %730 = vmatpush.msra.mxu1 %v694_v17  ;;  %v751_v46 = vld [vmem:[%s4253_s11] sm:$0xff]  ;;  %v830_v54 = vld [vmem:[%s4255_s13 + $0x10] sm:$0xff]  ;;  %v3170_v57 = vld [vmem:[%s4256_s14 + $0x18] sm:$0xff] }
  0x3c   : > { %708 = vmatpush.msra.mxu0 %v677_v18  ;;  %757 = vperm.xlu0 %2600, %v751_v46   ;;  %v3131_v50 = vld [vmem:[%s4256_s14] sm:$0xff] }
  0x3d   : > { %731 = vmatpush.msra.mxu1 %v693_v19  ;;  %2605 = vset.pattern.permute.xlu2 %v4278_v35  ;;  %v828_v52 = vld [vmem:[%s4255_s13] sm:$0xff] }
  0x3e   : > { %871 = vperm.xlu1 %2601, %v3066_v20   ;;  %709 = vmatpush.msra.mxu0 %v676_v21  ;;  %v747_v17 = vld [vmem:[%s4252_s10] sm:$0xff]  ;;  %v748_v21 = vld [vmem:[%s4252_s10 + $0x8] sm:$0xff] }
  0x3f   : > { %732 = vmatpush.msra.mxu1 %v692_v22  ;;  %928 = vperm.xlu2 %2605, %v3073_v25  }
  0x40   : > { %710 = vmatpush.msra.mxu0 %v675_v23 }
  0x41   : > { %733 = vmatpush.msra.mxu1 %v691_v24 }
  0x42   : > { %711 = vmatpush.msra.mxu0 %v674_v26  ;;  %v749_v26 = vld [vmem:[%s4252_s10 + $0x10] sm:$0xff] }
  0x43   : > { %734 = vmatpush.msra.mxu1 %v690_v27 }
  0x44   : > { %712 = vmatpush.msra.mxu0 %v673_v28  ;;  %762 = vperm.xlu0 %2600, %v752_v47  }
  0x45   : > { %735 = vmatpush.msra.mxu1 %v689_v29 }
  0x46   : > { %896 = vrot.lane.b32.xlu1 %v4280_v1, %s2853_s0  ;;  %713 = vmatpush.msra.mxu0 %v672_v30  ;;  %v750_v30 = vld [vmem:[%s4252_s10 + $0x18] sm:$0xff] }
  0x47   : > { %736 = vmatpush.msra.mxu1 %v688_v31  ;;  %2604 = vset.pattern.permute.xlu1 %v4278_v35 }
  0x48   : > { %714 = vmatpush.msra.mxu0 %v671_v32  ;;  %2606 = vset.pattern.permute.xlu2 %v4276_v43 }
  0x49   : > { %737 = vmatpush.msra.mxu1 %v687_v33  ;;  %944 = vperm.xlu2 %2606, %v3102_v45  }
  0x4a   : > { %715 = vmatpush.msra.mxu0 %v670_v34 }
  0x4b   : > { %738 = vmatpush.msra.mxu1 %v686_v36 }
  0x4c   : > { %716 = vmatpush.msra.mxu0 %v669_v37  ;;  %2603 = vset.pattern.permute.xlu0 %v4278_v35 }
  0x4d   : > { %739 = vmatpush.msra.mxu1 %v685_v38  ;;  %717 = vmatmul.f32.vlgmr.msra.gmra.mxu0 %v662_v39 }
  0x4e   : > { %740 = vmatmul.f32.vlgmr.msra.gmra.mxu1 %v663_v40  ;;  %924 = vperm.xlu1 %2604, %v3066_v20  }
  0x4f   : > { %1728 = vmatpush.msrb.mxu0 %v664_v41  ;;  %1751 = vmatpush.msrb.mxu1 %v665_v42 }
  0x50   : > { %920 = vperm.xlu0 %2603, %v3102_v45  }
  0x51   : > { %1729 = vmatpush.msrb.mxu0 %v662_v39  ;;  %1752 = vmatpush.msrb.mxu1 %v663_v40 }
  0x52   : > { %956 = vperm.xlu2 %2606, %v3096_v44  }
  0x55   : > { %720 = vmatmul.f32.gmra.mxu0 %v664_v41 }
  0x56   : > { %743 = vmatmul.f32.gmra.mxu1 %v665_v42  ;;  %932 = vperm.xlu1 %2604, %v3096_v44  }
  0x58   : > { %1024 = vrot.lane.b32.xlu0 %v4280_v1, %s2858_s25 }
  0x5a   : > { %973 = vrot.lane.b32.xlu2 %v4280_v1, %s2857_s21 }
  0x5b   : > { %2609 = vset.pattern.permute.xlu2 %v4274_v48 }
  0x5e   : > { %2607 = vset.pattern.permute.xlu1 %v4276_v43 }
  0x5f   : > { %952 = vperm.xlu1 %2607, %v3073_v25  }
  0x60   : > { %1142 = vperm.xlu0 %2603, %v3131_v50  }
  0x62   : > { %1003 = vperm.xlu2 %2609, %v3073_v25  }
  0x67   : > { %2608 = vset.pattern.permute.xlu1 %v4274_v48 }
  0x68   : > { %999 = vperm.xlu1 %2608, %v3066_v20   ;;  %2614 = vset.pattern.permute.xlu0 %v4276_v43 }
  0x69   : > { %948 = vperm.xlu0 %2614, %v3066_v20  }
  0x6a   : > { %2611 = vset.pattern.permute.xlu2 %v4272_v49 }
  0x6b   : > { %1050 = vperm.xlu2 %2611, %v3066_v20  }
  0x70   : > { %1007 = vperm.xlu1 %2608, %v3096_v44  }
  0x71   : > { %1219 = vperm.xlu0 %2614, %v3149_v53  }
  0x73   : > { %2612 = vset.pattern.permute.xlu2 %v4282_v0 }
  0x74   : > { %1071 = vperm.xlu2 %2612, %v828_v52  }
  0x78   : > { %2610 = vset.pattern.permute.xlu1 %v4272_v49 }
  0x79   : > { %1046 = vperm.xlu1 %2610, %v3102_v45   ;;  %2619 = vset.pattern.permute.xlu0 %v4274_v48 }
  0x7a   : > { %995 = vperm.xlu0 %2619, %v3102_v45  }
  0x7c   : > { %1081 = vperm.xlu2 %2612, %v830_v54  }
  0x81   : > { %1058 = vperm.xlu1 %2610, %v3096_v44  }
  0x84   : > { %1112 = vperm.xlu2 %2612, %v3161_v55  }
  0x87   : > { %v3174_v58 = vpop.permute.xlu2 %841 }
  0x89   : > { %2613 = vset.pattern.permute.xlu1 %v4282_v0 }
  0x8a   : > { %1076 = vperm.xlu1 %2613, %v829_v51  }
  0x8c   : > { %1122 = vperm.xlu2 %2612, %v3170_v57  }
  0x8f   : > { %v3182_v60 = vpop.permute.xlu2 %876 }
  0x92   : > { %1107 = vperm.xlu1 %2613, %v3131_v50  }
  0x94   : > { %2616 = vset.pattern.permute.xlu2 %v4278_v35 }
  0x95   : > { %1150 = vperm.xlu2 %2616, %v3149_v53  }
  0x99   : > { %v3188_v62 = vpop.permute.xlu2 %928 }
  0x9a   : > { %1117 = vperm.xlu1 %2613, %v3149_v53  }
  0x9d   : > { %2618 = vset.pattern.permute.xlu2 %v4276_v43 }
  0xa0   : > { %v3165_v56 = vpop.permute.xlu1 %767 }
  0xa2   : > { %2615 = vset.pattern.permute.xlu1 %v4278_v35 }
  0xa3   : > { %1146 = vperm.xlu1 %2615, %v3161_v55   ;;  %v3192_v2 = vpop.permute.xlu2 %944 }
  0xa8   : > { %v3177_v59 = vpop.permute.xlu1 %772 }
  0xab   : > { %1154 = vperm.xlu1 %2615, %v3170_v57  }
  0xac   : > { %v3196_v4 = vpop.permute.xlu2 %956 }
  0xae   : > { %v3202_v9 = vpop.permute.xlu0 %757 }
  0xb0   : > { %v3184_v61 = vpop.permute.xlu1 %871 }
  0xb3   : > { %2617 = vset.pattern.permute.xlu1 %v4276_v43 }
  0xb4   : > { %v3200_v8 = vpop.permute.xlu2 %973 }
  0xb6   : > { %v3208_v16 = vpop.permute.xlu0 %762 }
  0xb8   : > { %v3190_v63 = vpop.permute.xlu1 %896 }
  0xbc   : > { %v3206_v15 = vpop.permute.xlu2 %1003 }
  0xc0   : > { %v3194_v3 = vpop.permute.xlu1 %924 }
  0xc2   : > { %v3218_v20 = vpop.permute.xlu0 %920 }
  0xc5   : > { %v3216_v19 = vpop.permute.xlu2 %1050 }
  0xc8   : > { %v3198_v5 = vpop.permute.xlu1 %932 }
  0xca   : > { %v718_v6 = vpop.f32.mrf.mxu0  ;;  %v3228_v24 = vpop.permute.xlu0 %1024 }
  0xcb   : > { %v741_v7 = vpop.f32.mrf.mxu1 }
  0xcc   : > { %v742_v13 = vadd.f32 %v741_v7, %v718_v6 }
  0xce   : > { %v3226_v23 = vpop.permute.xlu2 %1071 }
  0xd1   : > { %v3204_v10 = vpop.permute.xlu1 %952 }
  0xd2   : > { %v721_v11 = vpop.f32.mrf.mxu0  ;;  %v3238_v29 = vpop.permute.xlu0 %1142 }
  0xd3   : > { %v744_v12 = vpop.f32.mrf.mxu1  ;;  %v1157_v31 = vmul.f32 0.0, %v3238_v29 }
  0xd4   : > { %v745_v14 = vadd.f32 %v744_v12, %v721_v11 }
  0xd5   : > { %1173 = vrot.lane.b32.xlu2 %v1157_v31, %s2860_s4 }
  0xd6   : > { %802 = vmatpush.msra.mxu2 %v745_v14  ;;  %v3236_v28 = vpop.permute.xlu2 %1081 }
  0xd8   : > { %803 = vmatpush.msra.mxu2 %v742_v13 }
  0xd9   : > { %2487 = vmatmul.msk.f32.vlgmr.msra.gmra.mxu2 %vm775_vm0, %v747_v17  ;;  %v1101_v17 = vld [vmem:[%s4257_s15] sm:$0xff] }
  0xda   : > { %v3214_v18 = vpop.permute.xlu1 %999 }
  0xdb   : > { %v3337_v11 = vpop.permute.xlu0 %948 }
  0xdd   : > { %1215 = vperm.xlu2 %2618, %v3161_v55  }
  0xde   : > { %v3248_v33 = vpop.permute.xlu2 %1112 }
  0xdf   : > { %4311 = vst [vmem:[#allocation18_spill] sm:$0xff] %v3248_v33 }
  0xe1   : > { %2488 = vmatmul.msk.f32.gmra.mxu2 %vm775_vm0, %v748_v21 }
  0xe2   : > { %v3224_v22 = vpop.permute.xlu1 %1007 }
  0xe5   : > { %2621 = vset.pattern.permute.xlu2 %v4272_v49 }
  0xe6   : > { %v3253_v36 = vpop.permute.xlu2 %1122 }
  0xe7   : > { %4312 = vst [vmem:[#allocation19_spill] sm:$0xff] %v3253_v36 }
  0xe9   : > { %2489 = vmatmul.msk.f32.gmra.mxu2 %vm775_vm0, %v749_v26  ;;  %v1102_v26 = vld [vmem:[%s4257_s15 + $0x8] sm:$0xff] }
  0xeb   : > { %v3234_v27 = vpop.permute.xlu1 %1046 }
  0xef   : > { %v3258_v38 = vpop.permute.xlu2 %1150 }
  0xf0   : > { %v1161_v39 = vmul.f32 0.0, %v3258_v38 }
  0xf1   : > { %2490 = vmatmul.msk.f32.gmra.mxu2 %vm775_vm0, %v750_v30 }
  0xf2   : > { %1181 = vrot.lane.b32.xlu0 %v1161_v39, %s2860_s4 }
  0xf3   : > { %v3246_v32 = vpop.permute.xlu1 %1058 }
  0xfa   : > { %1259 = vperm.xlu0 %2619, %v3161_v55  }
  0xfc   : > { %v3251_v34 = vpop.permute.xlu1 %1076 }
 0x102   : > { %2622 = vset.pattern.permute.xlu0 %v4272_v49 }
 0x103   : > { %1054 = vperm.xlu0 %2622, %v3073_v25   ;;  %v3295_v25 = vld [vmem:[%s4315_s5] ss:$0 sm:$0xff] }
 0x104   : > { %v3256_v37 = vpop.permute.xlu1 %1107 }
 0x105   : > { %4313 = vst [vmem:[#allocation20_spill] sm:$0xff] %v3256_v37 }
 0x10b   : > { %1336 = vperm.xlu0 %2622, %v3170_v57  }
 0x10c   : > { %v3262_v40 = vpop.permute.xlu1 %1117 }
 0x10d   : > { %4314 = vst [vmem:[#allocation21_spill] sm:$0xff] %v3262_v40 }
 0x113   : > { %2625 = vset.pattern.permute.xlu0 %v4282_v0 }
 0x114   : > { %866 = vperm.xlu0 %2625, %v3102_v45  }
 0x115   : > { %v3265_v41 = vpop.permute.xlu1 %1146 }
 0x116   : > { %v1159_v42 = vmul.f32 0.0, %v3265_v41 }
 0x118   : > { %1177 = vrot.lane.b32.xlu1 %v1159_v42, %s2860_s4 }
 0x11c   : > { %881 = vperm.xlu0 %2625, %v3096_v44  }
 0x11d   : > { %v3271_v46 = vpop.permute.xlu1 %1154 }
 0x11e   : > { %v1163_v47 = vmul.f32 0.0, %v3271_v46 }
 0x120   : > { %1211 = vperm.xlu1 %2617, %v3131_v50   ;;  %1185 = vrot.lane.b32.xlu2 %v1163_v47, %s2860_s4 }
 0x128   : > { %1223 = vperm.xlu1 %2617, %v3170_v57   ;;  %1324 = vperm.xlu2 %2621, %v3131_v50  }
 0x12f   : > { %v3332_v7 = vpop.permute.xlu2 %1173 }
 0x130   : > { %2620 = vset.pattern.permute.xlu1 %v4274_v48  ;;  %2624 = vset.pattern.permute.xlu2 %v4274_v48  ;;  %4316 = vst [vmem:[#allocation22_spill] sm:$0xff] %v3332_v7 }
 0x131   : > { %1255 = vperm.xlu1 %2620, %v3131_v50   ;;  %1263 = vperm.xlu2 %2624, %v3149_v53  }
 0x137   : > { %v3346_v14 = vpop.permute.xlu2 %1215 }
 0x139   : > { %2623 = vset.pattern.permute.xlu1 %v4272_v49  ;;  %1267 = vperm.xlu2 %2624, %v3170_v57  }
 0x13a   : > { %1328 = vperm.xlu1 %2623, %v3161_v55  }
 0x141   : > { %2626 = vset.pattern.permute.xlu2 %v4282_v0 }
 0x142   : > { %1332 = vperm.xlu1 %2623, %v3149_v53  }
 0x14a   : > { %2627 = vset.pattern.permute.xlu1 %v4282_v0 }
 0x15c   : > { %v805_v45 = vpop.f32.mrf.mxu2 }
 0x15d   : > { %v806_v44 = vadd.f32 %v805_v45, %v3202_v9 }
 0x15f   : > { %v3299_v50 = vmul.f32 %v3295_v25, %v806_v44 }
 0x161   : > { %971 = vrot.lane.b32.xlu1 %v3299_v50, %s2857_s21  ;;  %843 = vrot.lane.b32.xlu2 %v3299_v50, %s2852_s20 }
 0x164   : > { %v808_v51 = vpop.f32.mrf.mxu2 }
 0x165   : > { %v809_v52 = vadd.f32 %v808_v51, %v3208_v16  ;;  %v3348_v16 = vpop.permute.xlu0 %1219 }
 0x167   : > { %v3307_v53 = vmul.f32 %v3295_v25, %v809_v52 }
 0x169   : > { %845 = vrot.lane.b32.xlu0 %v3307_v53, %s2852_s20  ;;  %1026 = vrot.lane.b32.xlu1 %v3307_v53, %s2858_s25 }
 0x16a   : > { %898 = vrot.lane.b32.xlu2 %v3299_v50, %s2853_s0 }
 0x16c   : > { %v811_v54 = vpop.f32.mrf.mxu2 }
 0x16d   : > { %v812_v55 = vadd.f32 %v811_v54, %v3165_v56  ;;  %v831_v56 = vld [vmem:[%s4255_s13 + $0x18] sm:$0xff]  ;;  %v3360_v30 = vpop.permute.xlu0 %995 }
 0x16f   : > { %v3317_v57 = vmul.f32 %v3295_v25, %v812_v55 }
 0x171   : > { %900 = vrot.lane.b32.xlu0 %v3307_v53, %s2853_s0  ;;  %847 = vrot.lane.b32.xlu1 %v3317_v57, %s2852_s20 }
 0x172   : > { %1022 = vrot.lane.b32.xlu2 %v3299_v50, %s2858_s25 }
 0x174   : > { %v814_v6 = vpop.f32.mrf.mxu2 }
 0x175   : > { %v815_v9 = vadd.f32 %v814_v6, %v3177_v59  ;;  %v3366_v42 = vpop.permute.xlu0 %1181 }
 0x176   : > { %4319 = vst [vmem:[#allocation25_spill] sm:$0xff] %v3366_v42 }
 0x177   : > { %v3340_v12 = vmul.f32 %v3295_v25, %v815_v9 }
 0x179   : > { %975 = vrot.lane.b32.xlu0 %v3307_v53, %s2857_s21  ;;  %902 = vrot.lane.b32.xlu1 %v3317_v57, %s2853_s0 }
 0x17a   : > { %v3355_v21 = vpop.permute.xlu2 %1185 }
 0x17b   : > { %4318 = vst [vmem:[#allocation24_spill] sm:$0xff] %v3355_v21 }
 0x17d   : > { %v3375_v52 = vpop.permute.xlu0 %1259 }
 0x181   : > { %1086 = vperm.xlu0 %2625, %v831_v56   ;;  %977 = vrot.lane.b32.xlu1 %v3317_v57, %s2857_s21 }
 0x182   : > { %v3364_v39 = vpop.permute.xlu2 %1324 }
 0x183   : > { %v1340_v51 = vmul.f32 0.0, %v3364_v39 }
 0x185   : > { %v3384_v6 = vpop.permute.xlu0 %1054 }
 0x189   : > { %1030 = vrot.lane.b32.xlu0 %v3340_v12, %s2858_s25 }
 0x18a   : > { %v3344_v13 = vpop.permute.xlu1 %1177 }
 0x18b   : > { %4317 = vst [vmem:[#allocation23_spill] sm:$0xff] %v3344_v13  ;;  %v3372_v44 = vpop.permute.xlu2 %1263  ;;  %v1104_v13 = vld [vmem:[%s4257_s15 + $0x18] sm:$0xff] }
 0x191   : > { %1394 = vperm.xlu0 %2625, %v1101_v17  }
 0x192   : > { %v3353_v59 = vpop.permute.xlu1 %1211 }
 0x193   : > { %v3380_v55 = vpop.permute.xlu2 %1267 }
 0x199   : > { %1399 = vperm.xlu0 %2625, %v1102_v26   ;;  %v667_v26 = vld [vmem:[%s4320_s1] sm:$0x1]  ;;  %s654_s1 = sand.u32 1, %s2834_s22  }
 0x19a   : > { %v3362_v31 = vpop.permute.xlu1 %1223  ;;  %vm892_vm1 = vcmp.ge.s32.totalorder %v667_v26, 1  ;;  %vm832_vm2 = vcmp.ge.s32.totalorder %v667_v26, 2  ;;  %vm1018_vm6 = vcmp.lt.s32.totalorder %v667_v26, 6  ;;  %vm967_vm7 = vcmp.lt.s32.totalorder %v667_v26, 7 }
 0x19b   : > { %v833_v49 = vsel %vm832_vm2, 1, %v4282_v0 }
 0x1a3   : > { %v3368_v47 = vpop.permute.xlu1 %1255 }
 0x1a4   : > { %v1271_v45 = vmul.f32 0.0, %v3368_v47 }
 0x1a6   : > { %1288 = vrot.lane.b32.xlu2 %v1271_v45, %s2861_s29  ;;  %v3395_v45 = vpop.permute.xlu0 %1336 }
 0x1ac   : > { %v3377_v54 = vpop.permute.xlu1 %1328 }
 0x1ae   : > { %1357 = vrot.lane.b32.xlu2 %v1340_v51, %s2862_s30  ;;  %v893_v51 = vsel %vm892_vm1, 1, %v4282_v0  ;;  %v867_v21 = vpop.permute.xlu0 %866 }
 0x1af   : > { %v894_v48 = vperm.slane %v893_v51, 0 }
 0x1b1   : > { %vm3401_vm5 = vcmp.eq.s32.totalorder %v894_v48, 1  ;;  %v4325_v48 = vmov 0  }
 0x1b2   : > { %v1019_v36 = vsel %vm1018_vm6, 1, %v4325_v48  ;;  %v968_v42 = vsel %vm967_vm7, 1, %v4325_v48  ;;  %v1342_v48 = vmul.f32 0.0, %v3377_v54 }
 0x1b3   : > { %v1020_v40 = vperm.slane %v1019_v36, 0 }
 0x1b4   : > { %v3382_v56 = vpop.permute.xlu1 %1332 }
 0x1b5   : > { %v1344_v9 = vmul.f32 0.0, %v3382_v56  ;;  %vm3424_vm11 = vcmp.eq.s32.totalorder %v1020_v40, 1 }
 0x1b6   : > { %1028 = vrot.lane.b32.xlu2 %v3317_v57, %s2858_s25  ;;  %v3422_v7 = vpop.permute.xlu0 %881  ;;  %s2484_s25 = sshll.u32 %s654_s1, 5 }
 0x1b7   : > { %1365 = vrot.lane.b32.xlu1 %v1344_v9, %s2862_s30  ;;  %v834_v9 = vperm.slane %v833_v49, 0  ;;  %s4114_s24 = scalar_lea.vmem [#allocation7], %s2484_s25  ;;  %s2377_s25 = scalar_lea.sflag [#allocation4], %s654_s1 }
 0x1b8   : > { %s2389_s3 = sshll.u32 %s4114_s24, 4  ;;  %s2390_s3 = int_to_ptr.vmem [resolvable:$true] %s2389_s3 }
 0x1b9   : > { %vm3409_vm8 = vcmp.eq.s32.totalorder %v834_v9, 1 }
 0x1bb   : > { %v844_v17 = vpop.permute.xlu2 %843 }
 0x1bc   : > { %v852_v51 = vsel %vm851_vm4, %v3174_v58, %v844_v17  ;;  %v969_v17 = vperm.slane %v968_v42, 0  ;;  %v1273_v42 = vmul.f32 0.0, %v3375_v52 }
 0x1be   : > { %849 = vrot.lane.b32.xlu2 %v3340_v12, %s2852_s20  ;;  %vm3430_vm12 = vcmp.eq.s32.totalorder %v969_v17, 1  ;;  %s2863_s20 = smov 112  }
 0x1c4   : > { %v899_v43 = vpop.permute.xlu2 %898 }
 0x1c5   : > { %v907_v1 = vsel %vm906_vm3, %v3190_v63, %v899_v43  ;;  %v860_v43 = vsel %vm3409_vm8, %v852_v51, 0.0 }
 0x1c6   : > { %904 = vrot.lane.b32.xlu2 %v3340_v12, %s2853_s0  ;;  %v915_v49 = vsel %vm3401_vm5, %v907_v1, 0.0  ;;  %v884_v37 = vmul.f32 %v867_v21, %v860_v43  ;;  %v959_v21 = vmul.f32 %v3192_v2, %v3299_v50 }
 0x1c7   : > { %v935_v26 = vmul.f32 %v3218_v20, %v915_v49 }
 0x1c9   : > { %v939_v1 = vadd.f32 %v935_v26, %v884_v37 }
 0x1cb   : > { %v963_v43 = vadd.f32 %v959_v21, %v939_v1 }
 0x1cc   : > { %v1023_v9 = vpop.permute.xlu2 %1022 }
 0x1cd   : > { %v1033_v51 = vsel %vm1032_vm9, %v1023_v9, %v3228_v24 }
 0x1ce   : > { %979 = vrot.lane.b32.xlu2 %v3340_v12, %s2857_s21  ;;  %v1041_v40 = vsel %vm3424_vm11, %v1033_v51, 0.0 }
 0x1cf   : > { %v1061_v17 = vmul.f32 %v3234_v27, %v1041_v40 }
 0x1d3   : > { %v972_v36 = vpop.permute.xlu1 %971 }
 0x1d4   : > { %v982_v37 = vsel %vm981_vm10, %v972_v36, %v3200_v8 }
 0x1d5   : > { %v990_v49 = vsel %vm3430_vm12, %v982_v37, 0.0 }
 0x1d6   : > { %v1010_v26 = vmul.f32 %v3360_v30, %v990_v49  ;;  %1292 = vrot.lane.b32.xlu2 %v1273_v42, %s2861_s29 }
 0x1d8   : > { %v1014_v9 = vadd.f32 %v1010_v26, %v963_v43 }
 0x1da   : > { %v1065_v2 = vadd.f32 %v1061_v17, %v1014_v9  ;;  %v960_v17 = vmul.f32 %v3337_v11, %v3307_v53 }
 0x1db   : > { %v846_v50 = vpop.permute.xlu0 %845  ;;  %v1027_v21 = vpop.permute.xlu1 %1026 }
 0x1dc   : > { %v1089_v36 = vadd.f32 %v3226_v23, %v1065_v2  ;;  %v853_v27 = vsel %vm851_vm4, %v3174_v58, %v846_v50  ;;  %v1275_v23 = vmul.f32 0.0, %v3372_v44  ;;  %v1034_v49 = vsel %vm1032_vm9, %v1027_v21, %v3228_v24 }
 0x1de   : > { %v3449_v33 = vmul.f32 %v3295_v25, %v1089_v36  ;;  %1361 = vrot.lane.b32.xlu2 %v1342_v48, %s2862_s30  ;;  %v861_v48 = vsel %vm3409_vm8, %v853_v27, 0.0 }
 0x1df   : > { %v885_v37 = vmul.f32 %v3184_v61, %v861_v48  ;;  %v1042_v61 = vsel %vm3424_vm11, %v1034_v49, 0.0 }
 0x1e0   : > { %v1270_v1 = vmul.f32 %v3368_v47, %v3449_v33  ;;  %v1158_v30 = vmul.f32 %v3238_v29, %v3449_v33  ;;  %v1339_v40 = vmul.f32 %v3364_v39, %v3449_v33  ;;  %v1226_v9 = vmul.f32 %v3353_v59, %v3449_v33 }
 0x1e1   : > { %v1062_v53 = vmul.f32 %v3216_v19, %v1042_v61 }
 0x1e2   : > { %1286 = vrot.lane.b32.xlu1 %v1270_v1, %s2861_s29  ;;  %1175 = vrot.lane.b32.xlu0 %v1158_v30, %s2860_s4 }
 0x1e3   : > { %v901_v51 = vpop.permute.xlu0 %900  ;;  %v848_v36 = vpop.permute.xlu1 %847 }
 0x1e4   : > { %v908_v42 = vsel %vm906_vm3, %v3190_v63, %v901_v51 }
 0x1e5   : > { %v916_v47 = vsel %vm3401_vm5, %v908_v42, 0.0 }
 0x1e6   : > { %v936_v29 = vmul.f32 %v3194_v3, %v916_v47  ;;  %1296 = vrot.lane.b32.xlu2 %v1275_v23, %s2861_s29 }
 0x1e8   : > { %v940_v43 = vadd.f32 %v936_v29, %v885_v37 }
 0x1ea   : > { %1355 = vrot.lane.b32.xlu1 %v1339_v40, %s2862_s30  ;;  %v964_v2 = vadd.f32 %v960_v17, %v940_v43  ;;  %v1694_v40 = vld [vmem:[%s4330_s6] sm:$0xff] }
 0x1eb   : > { %v976_v26 = vpop.permute.xlu0 %975  ;;  %2499 = vmatmul.msk.f32.vlgmr.msrb.gmra.mxu0 %vm775_vm0, %v1694_v40  ;;  %2501 = vmatmul.msk.f32.vlgmr.msrb.gmra.mxu1 %vm775_vm0, %v1694_v40 }
 0x1ec   : > { %v983_v3 = vsel %vm981_vm10, %v976_v26, %v3200_v8 }
 0x1ed   : > { %v991_v39 = vsel %vm3430_vm12, %v983_v3, 0.0 }
 0x1ee   : > { %v1011_v50 = vmul.f32 %v3214_v18, %v991_v39  ;;  %1234 = vrot.lane.b32.xlu2 %v1226_v9, %s2863_s20  ;;  %v903_v18 = vpop.permute.xlu1 %902  ;;  %v1695_v39 = vld [vmem:[%s4330_s6 + $0x8] sm:$0xff] }
 0x1f0   : > { %v1015_v11 = vadd.f32 %v1011_v50, %v964_v2 }
 0x1f2   : > { %v1066_v1 = vadd.f32 %v1062_v53, %v1015_v11 }
 0x1f3   : > { %2500 = vmatmul.msk.f32.gmra.mxu0 %vm775_vm0, %v1695_v39  ;;  %2502 = vmatmul.msk.f32.gmra.mxu1 %vm775_vm0, %v1695_v39  ;;  %v1087_v50 = vpop.permute.xlu0 %1086 }
 0x1f4   : > { %v1090_v30 = vadd.f32 %v3251_v34, %v1066_v1  ;;  %v909_v34 = vsel %vm906_vm3, %v3190_v63, %v903_v18 }
 0x1f6   : > { %v3490_v59 = vmul.f32 %v3295_v25, %v1090_v30  ;;  %v978_v42 = vpop.permute.xlu1 %977 }
 0x1f7   : > { %v984_v21 = vsel %vm981_vm10, %v978_v42, %v3200_v8 }
 0x1f8   : > { %v1227_v27 = vmul.f32 %v3346_v14, %v3490_v59  ;;  %v1160_v51 = vmul.f32 %v3265_v41, %v3490_v59  ;;  %v1272_v23 = vmul.f32 %v3375_v52, %v3490_v59  ;;  %v854_v14 = vsel %vm851_vm4, %v3174_v58, %v848_v36 }
 0x1f9   : > { %v917_v41 = vsel %vm3401_vm5, %v909_v34, 0.0  ;;  %v862_v48 = vsel %vm3409_vm8, %v854_v14, 0.0  ;;  %v1341_v52 = vmul.f32 %v3377_v54, %v3490_v59  ;;  %v992_v49 = vsel %vm3430_vm12, %v984_v21, 0.0 }
 0x1fa   : > { %1236 = vrot.lane.b32.xlu1 %v1227_v27, %s2863_s20  ;;  %1179 = vrot.lane.b32.xlu2 %v1160_v51, %s2860_s4  ;;  %v937_v29 = vmul.f32 %v3188_v62, %v917_v41  ;;  %v886_v37 = vmul.f32 %v3182_v60, %v862_v48  ;;  %v961_v62 = vmul.f32 %v3204_v10, %v3317_v57  ;;  %v1277_v34 = vmul.f32 0.0, %v3380_v55 }
 0x1fb   : > { %v1012_v43 = vmul.f32 %v3206_v15, %v992_v49 }
 0x1fc   : > { %v941_v54 = vadd.f32 %v937_v29, %v886_v37  ;;  %v1346_v37 = vmul.f32 0.0, %v3395_v45 }
 0x1fe   : > { %v965_v17 = vadd.f32 %v961_v62, %v941_v54  ;;  %v4332_v62 = vmov 1  }
 0x200   : > { %v3498_v19 = vpop.permute.xlu2 %1288  ;;  %v1016_v9 = vadd.f32 %v1012_v43, %v965_v17 }
 0x202   : > { %1290 = vrot.lane.b32.xlu1 %v1272_v23, %s2861_s29  ;;  %v962_v23 = vmul.f32 %v3196_v4, %v3340_v12 }
 0x208   : > { %v3511_v47 = vpop.permute.xlu2 %1357 }
 0x20a   : > { %1359 = vrot.lane.b32.xlu1 %v1341_v52, %s2862_s30  ;;  %v4331_v52 = vmov 0.0  }
 0x210   : > { %v1029_v26 = vpop.permute.xlu2 %1028 }
 0x211   : > { %v1035_v60 = vsel %vm1032_vm9, %v1029_v26, %v3228_v24 }
 0x212   : > { %v1043_v3 = vsel %vm3424_vm11, %v1035_v60, 0.0 }
 0x213   : > { %v1063_v61 = vmul.f32 %v3384_v6, %v1043_v3 }
 0x215   : > { %v1067_v10 = vadd.f32 %v1063_v61, %v1016_v9 }
 0x217   : > { %v1091_v15 = vadd.f32 %v3236_v28, %v1067_v10  ;;  %v4334_v10 = vld [vmem:[#allocation23_spill] sm:$0xff] }
 0x218   : > { %v850_v57 = vpop.permute.xlu2 %849 }
 0x219   : > { %v3542_v2 = vmul.f32 %v3295_v25, %v1091_v15  ;;  %v855_v28 = vsel %vm851_vm4, %v3174_v58, %v850_v57  ;;  %v1031_v58 = vpop.permute.xlu0 %1030 }
 0x21a   : > { %v1036_v0 = vsel %vm1032_vm9, %v1031_v58, %v3228_v24 }
 0x21b   : > { %v1162_v53 = vmul.f32 %v3258_v38, %v3542_v2  ;;  %v1228_v6 = vmul.f32 %v3348_v16, %v3542_v2  ;;  %v1343_v11 = vmul.f32 %v3382_v56, %v3542_v2  ;;  %v863_v38 = vsel %vm3409_vm8, %v855_v28, 0.0  ;;  %v1103_v56 = vld [vmem:[%s4257_s15 + $0x10] sm:$0xff] }
 0x21c   : > { %v1274_v27 = vmul.f32 %v3372_v44, %v3542_v2  ;;  %v887_v51 = vmul.f32 %v3422_v7, %v863_v38  ;;  %v1044_v44 = vsel %vm3424_vm11, %v1036_v0, 0.0 }
 0x21d   : > { %1183 = vrot.lane.b32.xlu1 %v1162_v53, %s2860_s4  ;;  %1238 = vrot.lane.b32.xlu2 %v1228_v6, %s2863_s20  ;;  %v1064_v24 = vmul.f32 %v3246_v32, %v1044_v44  ;;  %v1697_v32 = vld [vmem:[%s4249_s7 + $0x8] sm:$0xff] }
 0x21e   : > { %1363 = vrot.lane.b32.xlu0 %v1343_v11, %s2862_s30 }
 0x220   : > { %v905_v36 = vpop.permute.xlu2 %904 }
 0x221   : > { %v910_v1 = vsel %vm906_vm3, %v3190_v63, %v905_v36  ;;  %v1395_v26 = vpop.permute.xlu0 %1394  ;;  %v4335_v36 = vld [vmem:[#allocation22_spill] sm:$0xff] }
 0x222   : > { %v918_v16 = vsel %vm3401_vm5, %v910_v1, 0.0  ;;  %v4336_v1 = vld [vmem:[#allocation20_spill] sm:$0xff] }
 0x223   : > { %v938_v30 = vmul.f32 %v3198_v5, %v918_v16  ;;  %v1125_v38 = vmul.f32 0.0, %v4336_v1  ;;  %v1126_v0 = vmul.f32 %v4336_v1, %v3449_v33 }
 0x225   : > { %1294 = vrot.lane.b32.xlu1 %v1274_v27, %s2861_s29  ;;  %1404 = vperm.xlu2 %2626, %v1103_v56   ;;  %v942_v35 = vadd.f32 %v938_v30, %v887_v51 }
 0x227   : > { %v966_v14 = vadd.f32 %v962_v23, %v942_v35 }
 0x228   : > { %v980_v18 = vpop.permute.xlu2 %979 }
 0x229   : > { %v985_v5 = vsel %vm981_vm10, %v980_v18, %v3200_v8  ;;  %v3608_v40 = vpop.permute.xlu1 %1365  ;;  %v1400_v39 = vpop.permute.xlu0 %1399 }
 0x22a   : > { %v993_v7 = vsel %vm3430_vm12, %v985_v5, 0.0 }
 0x22b   : > { %v1013_v41 = vmul.f32 %v3224_v22, %v993_v7 }
 0x22d   : > { %v1017_v42 = vadd.f32 %v1013_v41, %v966_v14  ;;  %1300 = vrot.lane.b32.xlu1 %v1277_v34, %s2861_s29 }
 0x22f   : > { %v1068_v4 = vadd.f32 %v1064_v24, %v1017_v42 }
 0x230   : > { %v1293_v29 = vpop.permute.xlu2 %1292 }
 0x231   : > { %v1092_v12 = vadd.f32 %v1087_v50, %v1068_v4 }
 0x233   : > { %v3587_v48 = vmul.f32 %v3295_v25, %v1092_v12 }
 0x235   : > { %1409 = vperm.xlu1 %2627, %v1104_v13   ;;  %v1345_v20 = vmul.f32 %v3395_v45, %v3587_v48  ;;  %v1164_v22 = vmul.f32 %v3271_v46, %v3587_v48  ;;  %v1229_v25 = vmul.f32 %v3362_v31, %v3587_v48  ;;  %v1276_v46 = vmul.f32 %v3380_v55, %v3587_v48  ;;  %v1696_v31 = vld [vmem:[%s4249_s7] sm:$0xff] }
 0x236   : > { %v4333_v45 = vld [vmem:[#allocation18_spill] sm:$0xff] }
 0x237   : > { %1367 = vrot.lane.b32.xlu2 %v1345_v20, %s2862_s30  ;;  %1187 = vrot.lane.b32.xlu0 %v1164_v22, %s2860_s4  ;;  %v1128_v60 = vmul.f32 %v4333_v45, %v3490_v59  ;;  %v1127_v50 = vmul.f32 0.0, %v4333_v45  ;;  %s4352_s4 = sld [smem:[#allocation29_spill]] }
 0x238   : > { %v1362_v21 = vpop.permute.xlu2 %1361 }
 0x23d   : > { %1705 = vperm.xlu1 %2627, %v1697_v32  }
 0x23f   : > { %1240 = vrot.lane.b32.xlu0 %v1229_v25, %s2863_s20  ;;  %1778 = vrot.lane.b32.xlu2 %v4331_v52, %s2864_s28 }
 0x240   : > { %v3613_v49 = vpop.permute.xlu2 %1296 }
 0x247   : > { %1298 = vrot.lane.b32.xlu0 %v1276_v46, %s2861_s29  ;;  %s2869_s29 = smov 113  }
 0x248   : > { %v1235_v55 = vpop.permute.xlu2 %1234 }
 0x24f   : > { %1369 = vrot.lane.b32.xlu0 %v1346_v37, %s2862_s30  ;;  %v4337_v37 = vld [vmem:[#allocation21_spill] sm:$0xff]  ;;  %s2871_s30 = smov 111  }
 0x254   : > { %v1287_v54 = vpop.permute.xlu1 %1286  ;;  %v1180_v17 = vpop.permute.xlu2 %1179 }
 0x255   : > { %v1205_v3 = vadd.f32 %v1180_v17, %v1128_v60  ;;  %v1191_v15 = vsel %vm1189_vm13, %v4334_v10, %v1180_v17  ;;  %v1176_v6 = vpop.permute.xlu0 %1175  ;;  %v1303_v24 = vsel %vm1302_vm14, %v1287_v54, %v3498_v19 }
 0x256   : > { %v1204_v53 = vadd.f32 %v1191_v15, %v1127_v50  ;;  %v1190_v59 = vsel %vm1189_vm13, %v4335_v36, %v1176_v6  ;;  %v1203_v23 = vadd.f32 %v1176_v6, %v1126_v0 }
 0x257   : > { %1700 = vperm.xlu0 %2625, %v1696_v31   ;;  %v1202_v27 = vadd.f32 %v1190_v59, %v1125_v38  ;;  %v1130_v31 = vmul.f32 %v4337_v37, %v3542_v2 }
 0x258   : > { %v1247_v14 = vadd.f32 %v1235_v55, %v1203_v23 }
 0x259   : > { %v1246_v44 = vadd.f32 %v1235_v55, %v1202_v27 }
 0x25a   : > { %v1316_v4 = vadd.f32 %v1303_v24, %v1247_v14 }
 0x25b   : > { %v1315_v41 = vadd.f32 %v1287_v54, %v1246_v44 }
 0x25c   : > { %v1356_v43 = vpop.permute.xlu1 %1355 }
 0x25d   : > { %v1372_v42 = vsel %vm1371_vm15, %v1356_v43, %v3511_v47  ;;  %v1384_v33 = vadd.f32 %v1356_v43, %v1315_v41 }
 0x25e   : > { %v1385_v20 = vadd.f32 %v1372_v42, %v1316_v4  ;;  %v4339_v42 = vld [vmem:[#allocation19_spill] sm:$0xff] }
 0x25f   : > { %2638 = vset.pattern.permute.xlu0 %v4332_v62  ;;  %v1412_v25 = vadd.f32 %v1395_v26, %v1384_v33  ;;  %v1132_v4 = vmul.f32 %v4339_v42, %v3587_v48 }
 0x26c   : > { %v1237_v9 = vpop.permute.xlu1 %1236 }
 0x26d   : > { %v1249_v61 = vadd.f32 %v1237_v9, %v1205_v3  ;;  %v1248_v11 = vadd.f32 %v1237_v9, %v1204_v53 }
 0x274   : > { %v1291_v57 = vpop.permute.xlu1 %1290 }
 0x275   : > { %v1304_v28 = vsel %vm1302_vm14, %v1291_v57, %v1293_v29  ;;  %v1317_v16 = vadd.f32 %v1291_v57, %v1248_v11  ;;  %v1413_v29 = vadd.f32 %v1395_v26, %v1385_v20 }
 0x276   : > { %v1318_v56 = vadd.f32 %v1304_v28, %v1249_v61 }
 0x277   : > { %v2492_v54 = vmul.f32 -1.442695, %v1413_v29  ;;  %v1239_v60 = vpop.permute.xlu2 %1238 }
 0x27c   : > { %v1360_v30 = vpop.permute.xlu1 %1359 }
 0x27d   : > { %v1373_v58 = vsel %vm1371_vm15, %v1360_v30, %v1362_v21  ;;  %v1386_v51 = vadd.f32 %v1360_v30, %v1317_v16  ;;  %v2491_v21 = vmul.f32 -1.442695, %v1412_v25  ;;  %v4340_v25 = vld [vmem:[#allocation24_spill] sm:$0xff] }
 0x27e   : > { %v1387_v35 = vadd.f32 %v1373_v58, %v1318_v56 }
 0x27f   : > { %v1414_v18 = vadd.f32 %v1400_v39, %v1386_v51 }
 0x280   : > { %v1415_v5 = vadd.f32 %v1400_v39, %v1387_v35  ;;  %v4338_v35 = vld [vmem:[#allocation25_spill] sm:$0xff] }
 0x281   : > { %v2493_v7 = vmul.f32 -1.442695, %v1414_v18 }
 0x282   : > { %v2494_v34 = vmul.f32 -1.442695, %v1415_v5  ;;  %v1129_v5 = vmul.f32 0.0, %v4337_v37  ;;  %v1405_v37 = vpop.permute.xlu2 %1404 }
 0x283   : > { %2676 = vpow2.f32 %v2493_v7  ;;  %v3653_v7 = vpop.f32.mrf.mxu0 }
 0x284   : > { %2678 = vpow2.f32 %v2494_v34 }
 0x289   : > { %v2677_v12 = vpop.eup %2676 }
 0x28a   : > { %v2679_v13 = vpop.eup %2678  ;;  %v1446_v22 = vadd.f32 1.0, %v2677_v12 }
 0x28b   : > { %v1447_v32 = vadd.f32 1.0, %v2679_v13 }
 0x28c   : > { %2680 = vrcp.f32 %v1446_v22  ;;  %v1491_v3 = vand.u32 2147483647, %v1446_v22  ;;  %v1493_v9 = vand.u32 2147483648, %v1446_v22  ;;  %vm1487_vm4 = vweird.f32 %v1446_v22 }
 0x28d   : > { %2682 = vrcp.f32 %v1447_v32  ;;  %v1508_v57 = vand.u32 2147483648, %v1447_v32  ;;  %v1506_v53 = vand.u32 2147483647, %v1447_v32  ;;  %vm1502_vm6 = vweird.f32 %v1447_v32 }
 0x28e   : > { %2684 = vpow2.f32 %v2491_v21  ;;  %v1494_v36 = vor.u32 1.1754944e-38, %v1493_v9  ;;  %vm1492_vm7 = vcmp.eq.f32.partialorder %v1491_v3, 8.507059e+37  ;;  %v1131_v21 = vmul.f32 0.0, %v4339_v42 }
 0x28f   : > { %v1184_v46 = vpop.permute.xlu1 %1183  ;;  %2686 = vpow2.f32 %v2492_v54  ;;  %v1509_v56 = vor.u32 1.1754944e-38, %v1508_v57  ;;  %vm1507_vm9 = vcmp.eq.f32.partialorder %v1506_v53, 8.507059e+37 }
 0x290   : > { %v1207_v47 = vadd.f32 %v1184_v46, %v1130_v31  ;;  %v1364_v26 = vpop.permute.xlu0 %1363  ;;  %v1192_v18 = vsel %vm1189_vm13, %v4338_v35, %v1184_v46  ;;  %v1734_v46 = vpop.f32.mrf.mxu0 }
 0x291   : > { %v1374_v28 = vsel %vm1371_vm15, %v1364_v26, %v3608_v40  ;;  %v1206_v44 = vadd.f32 %v1192_v18, %v1129_v5 }
 0x292   : > { %v2681_v19 = vpop.eup %2680  ;;  %v1251_v39 = vadd.f32 %v1239_v60, %v1207_v47 }
 0x293   : > { %v2683_v55 = vpop.eup %2682  ;;  %v1483_v17 = vmul.f32 %v2681_v19, %v1446_v22  ;;  %vm1488_vm1 = vweird.f32 %v2681_v19  ;;  %v1250_v34 = vadd.f32 %v1239_v60, %v1206_v44 }
 0x294   : > { %v1498_v45 = vmul.f32 %v2683_v55, %v1447_v32  ;;  %vm1503_vm2 = vweird.f32 %v2683_v55  ;;  %vm1489_vm5 = vmor %vm1487_vm4, %vm1488_vm1  ;;  %v2685_v1 = vpop.eup %2684 }
 0x295   : > { %v1484_v43 = vsub.f32 1.0, %v1483_v17  ;;  %vm1504_vm8 = vmor %vm1502_vm6, %vm1503_vm2  ;;  %v3642_v51 = vadd.f32 1.0, %v2685_v1  ;;  %v1368_v1 = vpop.permute.xlu2 %1367 }
 0x296   : > { %v1499_v61 = vsub.f32 1.0, %v1498_v45 }
 0x297   : > { %v1295_v10 = vpop.permute.xlu1 %1294  ;;  %v1485_v15 = vmul.f32 %v2681_v19, %v1484_v43  ;;  %2688 = vrcp.f32 %v3642_v51  ;;  %vm1457_vm11 = vweird.f32 %v3642_v51  ;;  %v1463_v53 = vand.u32 2147483648, %v3642_v51 }
 0x298   : > { %v1305_v2 = vsel %vm1302_vm14, %v1295_v10, %v3613_v49  ;;  %v1500_v50 = vmul.f32 %v2683_v55, %v1499_v61  ;;  %v2687_v49 = vpop.eup %2686  ;;  %v1319_v24 = vadd.f32 %v1295_v10, %v1250_v34 }
 0x299   : > { %v1320_v6 = vadd.f32 %v1305_v2, %v1251_v39  ;;  %v1486_v11 = vadd.f32 %v2681_v19, %v1485_v15  ;;  %v3646_v0 = vadd.f32 1.0, %v2687_v49  ;;  %v3675_v2 = vld [vmem:[%s4250_s8 + $0x8] sm:$0xff] }
 0x29a   : > { %v1501_v59 = vadd.f32 %v2683_v55, %v1500_v50  ;;  %v1388_v22 = vadd.f32 %v1364_v26, %v1319_v24  ;;  %v1461_v50 = vand.u32 2147483647, %v3642_v51 }
 0x29b   : > { %v1389_v38 = vadd.f32 %v1374_v28, %v1320_v6  ;;  %v1490_v16 = vsel %vm1489_vm5, %v2681_v19, %v1486_v11  ;;  %2690 = vrcp.f32 %v3646_v0  ;;  %v1478_v6 = vand.u32 2147483648, %v3646_v0 }
 0x29c   : > { %v3638_v30 = vsel %vm1492_vm7, %v1494_v36, %v1490_v16  ;;  %v1505_v27 = vsel %vm1504_vm8, %v2683_v55, %v1501_v59  ;;  %v1416_v54 = vadd.f32 %v1405_v37, %v1388_v22  ;;  %vm1472_vm2 = vweird.f32 %v3646_v0  ;;  %v1602_v22 = vld [vmem:[#allocation5 + $0xf0] sm:$0xff]  ;;  %v3731_v36 = vld [vmem:[%s4250_s8] sm:$0xff] }
 0x29d   : > { %v3640_v58 = vsel %vm1507_vm9, %v1509_v56, %v1505_v27  ;;  %v2689_v41 = vpop.eup %2688  ;;  %v1417_v17 = vadd.f32 %v1405_v37, %v1389_v38  ;;  %v1476_v59 = vand.u32 2147483647, %v3646_v0  ;;  %v1464_v27 = vor.u32 1.1754944e-38, %v1463_v53  ;;  %1636 = vmatpush.msra.mxu3 %v1602_v22  ;;  %v1593_v53 = vld [vmem:[#allocation5 + $0xa8] sm:$0xff] }
 0x29e   : > { %v2633_v40 = vpack.i.bf16 %v3640_v58, %v3638_v30  ;;  %v1453_v20 = vmul.f32 %v2689_v41, %v3642_v51  ;;  %v2495_v9 = vmul.f32 -1.442695, %v1416_v54  ;;  %vm1458_vm12 = vweird.f32 %v2689_v41  ;;  %v1599_v54 = vld [vmem:[#allocation5 + $0xd8] sm:$0xff] }
 0x29f   : > { %v1301_v23 = vpop.permute.xlu1 %1300  ;;  %v2496_v26 = vmul.f32 -1.442695, %v1417_v17  ;;  %vm3681_vm1 = vmor %vm1457_vm11, %vm1458_vm12  ;;  %v1479_v51 = vor.u32 1.1754944e-38, %v1478_v6  ;;  %vm1477_vm5 = vcmp.eq.f32.partialorder %v1476_v59, 8.507059e+37 }
 0x2a0   : > { %v1454_v19 = vsub.f32 1.0, %v1453_v20  ;;  %2692 = vpow2.f32 %v2495_v9 }
 0x2a1   : > { %v2691_v12 = vpop.eup %2690  ;;  %2694 = vpow2.f32 %v2496_v26 }
 0x2a2   : > { %v1468_v32 = vmul.f32 %v2691_v12, %v3646_v0  ;;  %v1455_v61 = vmul.f32 %v2689_v41, %v1454_v19  ;;  %v1598_v19 = vld [vmem:[#allocation5 + $0xd0] sm:$0xff] }
 0x2a4   : > { %v1469_v47 = vsub.f32 1.0, %v1468_v32  ;;  %v1456_v10 = vadd.f32 %v2689_v41, %v1455_v61  ;;  %v1603_v32 = vld [vmem:[#allocation5 + $0xf8] sm:$0xff]  ;;  %v1594_v61 = vld [vmem:[#allocation5 + $0xb0] sm:$0xff] }
 0x2a5   : > { %1665 = vmatpush.msrb.mxu2 %v1603_v32 }
 0x2a6   : > { %v1470_v39 = vmul.f32 %v2691_v12, %v1469_v47  ;;  %v1460_v56 = vsel %vm3681_vm1, %v2689_v41, %v1456_v10  ;;  %v2693_v35 = vpop.eup %2692 }
 0x2a7   : > { %v3655_v14 = vpop.permute.xlu1 %1409  ;;  %v3691_v34 = vadd.f32 1.0, %v2693_v35 }
 0x2a8   : > { %v1471_v15 = vadd.f32 %v2691_v12, %v1470_v39  ;;  %v1595_v39 = vld [vmem:[#allocation5 + $0xb8] sm:$0xff] }
 0x2a9   : > { %v1188_v33 = vpop.permute.xlu0 %1187 }
 0x2aa   : > { %v1209_v13 = vadd.f32 %v1188_v33, %v1132_v4  ;;  %v1193_v29 = vsel %vm1189_vm13, %v4340_v25, %v1188_v33  ;;  %vm1473_vm13 = vweird.f32 %v2691_v12  ;;  %v1600_v25 = vld [vmem:[#allocation5 + $0xe0] sm:$0xff] }
 0x2ab   : > { %v1208_v48 = vadd.f32 %v1193_v29, %v1131_v21  ;;  %vm1474_vm4 = vmor %vm1472_vm2, %vm1473_vm13  ;;  %1637 = vmatpush.msra.mxu3 %v1600_v25 }
 0x2ac   : > { %v1475_v49 = vsel %vm1474_vm4, %v2691_v12, %v1471_v15  ;;  %v1754_v12 = vpop.f32.mrf.mxu1 }
 0x2ad   : > { %v1480_v0 = vsel %vm1477_vm5, %v1479_v51, %v1475_v49  ;;  %1638 = vmatpush.msra.mxu3 %v1598_v19  ;;  %v1523_v51 = vand.u32 2147483648, %v3691_v34 }
 0x2af   : > { %v3664_v31 = vpop.permute.xlu1 %1705  ;;  %v1524_v25 = vor.u32 1.1754944e-38, %v1523_v51  ;;  %v3810_v51 = vld [vmem:[%s4352_s4] sm:$0x3] }
 0x2b0   : > { %v1735_v55 = vadd.f32 %v1734_v46, %v3664_v31  ;;  %v1601_v46 = vld [vmem:[#allocation5 + $0xe8] sm:$0xff] }
 0x2b1   : > { %v1241_v45 = vpop.permute.xlu0 %1240  ;;  %1666 = vmatpush.msrb.mxu2 %v1601_v46 }
 0x2b2   : > { %v3667_v43 = vmax.f32 %v1735_v55, 0.0  ;;  %v1252_v60 = vadd.f32 %v1241_v45, %v1208_v48  ;;  %v1253_v3 = vadd.f32 %v1241_v45, %v1209_v13 }
 0x2b3   : > { %1667 = vmatpush.msrb.mxu2 %v1599_v54 }
 0x2b4   : > { %1784 = vrot.lane.b32.xlu2 %v3667_v43, %s2864_s28  ;;  %v1757_v9 = vpop.f32.mrf.mxu1 }
 0x2b9   : > { %v1299_v57 = vpop.permute.xlu0 %1298 }
 0x2ba   : > { %v1306_v11 = vsel %vm1302_vm14, %v1299_v57, %v1301_v23  ;;  %v1321_v28 = vadd.f32 %v1299_v57, %v1252_v60  ;;  %vm1462_vm14 = vcmp.eq.f32.partialorder %v1461_v50, 8.507059e+37  ;;  %v2695_v23 = vpop.eup %2694  ;;  %v1596_v60 = vld [vmem:[#allocation5 + $0xc0] sm:$0xff]  ;;  %v1758_v57 = vadd.f32 %v1757_v9, %v3664_v31  ;;  %v1591_v9 = vld [vmem:[#allocation5 + $0x98] sm:$0xff] }
 0x2bb   : > { %v1322_v38 = vadd.f32 %v1306_v11, %v1253_v3  ;;  %v1465_v5 = vsel %vm1462_vm14, %v1464_v27, %v1460_v56  ;;  %v3693_v42 = vadd.f32 1.0, %v2695_v23  ;;  %v1597_v3 = vld [vmem:[#allocation5 + $0xc8] sm:$0xff]  ;;  %1639 = vmatpush.msra.mxu3 %v1596_v60  ;;  %v1592_v50 = vld [vmem:[#allocation5 + $0xa0] sm:$0xff]  ;;  %v1521_v27 = vand.u32 2147483647, %v3691_v34 }
 0x2bc   : > { %v1390_v16 = vadd.f32 %v1368_v1, %v1321_v28  ;;  %1808 = vperm.xlu2 %2626, %v3675_v2   ;;  %v2628_v4 = vpack.i.bf16 %v1480_v0, %v1465_v5  ;;  %1668 = vmatpush.msrb.mxu2 %v1597_v3  ;;  %v3733_v31 = vmax.f32 %v1758_v57, 0.0  ;;  %v4351_v60 = vmov 2   ;;  %v1590_v3 = vld [vmem:[#allocation5 + $0x90] sm:$0xff] }
 0x2bd   : > { %1640 = vmatpush.msra.mxu3 %v1594_v61  ;;  %vm1532_vm7 = vweird.f32 %v3693_v42  ;;  %v1536_v23 = vand.u32 2147483647, %v3693_v42  ;;  %vm3775_vm2 = vcmp.eq.f32.partialorder %v1521_v27, 8.507059e+37  ;;  %v1589_v61 = vld [vmem:[#allocation5 + $0x88] sm:$0xff]  ;;  %v1582_v57 = vld [vmem:[#allocation5 + $0x50] sm:$0xff]  ;;  %v3805_v27 = vpop.permute.xlu2 %1778 }
 0x2be   : > { %v1418_v18 = vadd.f32 %v3655_v14, %v1390_v16  ;;  %1669 = vmatpush.msrb.mxu2 %v1595_v39  ;;  %v1586_v39 = vld [vmem:[#allocation5 + $0x70] sm:$0xff] }
 0x2bf   : > { %1641 = vmatpush.msra.mxu3 %v1592_v50  ;;  %v1583_v50 = vld [vmem:[#allocation5 + $0x58] sm:$0xff] }
 0x2c0   : > { %v2497_v44 = vmul.f32 -1.442695, %v1418_v18  ;;  %1670 = vmatpush.msrb.mxu2 %v1593_v53  ;;  %v1580_v53 = vld [vmem:[#allocation5 + $0x40] sm:$0xff] }
 0x2c1   : > { %v1370_v24 = vpop.permute.xlu0 %1369  ;;  %1642 = vmatpush.msra.mxu3 %v1590_v3 }
 0x2c2   : > { %2696 = vpow2.f32 %v2497_v44  ;;  %v1375_v41 = vsel %vm1371_vm15, %v1368_v1, %v1370_v24  ;;  %vm1517_vm15 = vweird.f32 %v3691_v34  ;;  %1671 = vmatpush.msrb.mxu2 %v1591_v9 }
 0x2c3   : > { %v1391_v33 = vadd.f32 %v1375_v41, %v1322_v38  ;;  %2698 = vrcp.f32 %v3691_v34 }
 0x2c4   : > { %2629 = vrot.lane.b32.xlu2 %v2628_v4, %s4289_s27  ;;  %2700 = vrcp.f32 %v3693_v42  ;;  %1672 = vmatpush.msrb.mxu2 %v1589_v61 }
 0x2c5   : > { %v1419_v13 = vadd.f32 %v3655_v14, %v1391_v33 }
 0x2c7   : > { %v2498_v20 = vmul.f32 -1.442695, %v1419_v13 }
 0x2c8   : > { %v2697_v29 = vpop.eup %2696 }
 0x2c9   : > { %v3700_v21 = vadd.f32 1.0, %v2697_v29  ;;  %2702 = vpow2.f32 %v2498_v20  ;;  %v1701_v37 = vpop.permute.xlu0 %1700  ;;  %v3703_v14 = vpop.eup %2698 }
 0x2ca   : > { %v1732_v48 = vadd.f32 %v3653_v7, %v1701_v37  ;;  %v1755_v55 = vadd.f32 %v1754_v12, %v1701_v37  ;;  %v3706_v47 = vpop.eup %2700  ;;  %v1513_v7 = vmul.f32 %v3703_v14, %v3691_v34  ;;  %vm1518_vm6 = vweird.f32 %v3703_v14 }
 0x2cb   : > { %2704 = vrcp.f32 %v3700_v21  ;;  %v1528_v10 = vmul.f32 %v3706_v47, %v3693_v42  ;;  %vm1533_vm8 = vweird.f32 %v3706_v47  ;;  %vm3753_vm11 = vmor %vm1517_vm15, %vm1518_vm6  ;;  %v1538_v34 = vand.u32 2147483648, %v3693_v42 }
 0x2cc   : > { %v3708_v17 = vmax.f32 %v1732_v48, 0.0  ;;  %v3710_v45 = vmax.f32 %v1755_v55, 0.0  ;;  %v1514_v11 = vsub.f32 1.0, %v1513_v7  ;;  %vm1547_vm12 = vweird.f32 %v3700_v21  ;;  %vm3761_vm13 = vmor %vm1532_vm7, %vm1533_vm8  ;;  %v1588_v7 = vld [vmem:[#allocation5 + $0x80] sm:$0xff] }
 0x2cd   : > { %v1529_v59 = vsub.f32 1.0, %v1528_v10  ;;  %v1553_v41 = vand.u32 2147483648, %v3700_v21  ;;  %v1551_v33 = vand.u32 2147483647, %v3700_v21  ;;  %v1539_v29 = vor.u32 1.1754944e-38, %v1538_v34  ;;  %1643 = vmatpush.msra.mxu3 %v1588_v7  ;;  %v1584_v10 = vld [vmem:[#allocation5 + $0x60] sm:$0xff] }
 0x2ce   : > { %1782 = vrot.lane.b32.xlu1 %v3710_v45, %s2864_s28  ;;  %1780 = vrot.lane.b32.xlu0 %v3708_v17, %s2864_s28  ;;  %v1515_v38 = vmul.f32 %v3703_v14, %v1514_v11  ;;  %vm1537_vm15 = vcmp.eq.f32.partialorder %v1536_v23, 8.507059e+37  ;;  %v1578_v11 = vld [vmem:[#allocation5 + $0x30] sm:$0xff]  ;;  %vm1768_vm8 = vcmp.ge.s32.totalorder %v3810_v51, 1 }
 0x2cf   : > { %v2703_v26 = vpop.eup %2702  ;;  %v1530_v16 = vmul.f32 %v3706_v47, %v1529_v59  ;;  %v1554_v46 = vor.u32 1.1754944e-38, %v1553_v41  ;;  %vm1552_vm6 = vcmp.eq.f32.partialorder %v1551_v33, 8.507059e+37  ;;  %1644 = vmatpush.msra.mxu3 %v1586_v39  ;;  %v1576_v59 = vld [vmem:[#allocation5 + $0x20] sm:$0xff] }
 0x2d0   : > { %v3720_v15 = vadd.f32 1.0, %v2703_v26  ;;  %v1516_v18 = vadd.f32 %v3703_v14, %v1515_v38  ;;  %v1587_v26 = vld [vmem:[#allocation5 + $0x78] sm:$0xff]  ;;  %v1574_v38 = vld [vmem:[#allocation5 + $0x10] sm:$0xff] }
 0x2d1   : > { %v3723_v6 = vpop.eup %2704  ;;  %v1531_v5 = vadd.f32 %v3706_v47, %v1530_v16  ;;  %1673 = vmatpush.msrb.mxu2 %v1587_v26  ;;  %1645 = vmatpush.msra.mxu3 %v1584_v10  ;;  %v1575_v16 = vld [vmem:[#allocation5 + $0x18] sm:$0xff] }
 0x2d2   : > { %2706 = vrcp.f32 %v3720_v15  ;;  %v1543_v28 = vmul.f32 %v3723_v6, %v3700_v21  ;;  %vm1548_vm9 = vweird.f32 %v3723_v6  ;;  %v1568_v4 = vand.u32 2147483648, %v3720_v15 }
 0x2d3   : > { %v1566_v20 = vand.u32 2147483647, %v3720_v15  ;;  %v1520_v42 = vsel %vm3753_vm11, %v3703_v14, %v1516_v18  ;;  %vm3781_vm4 = vmor %vm1547_vm12, %vm1548_vm9  ;;  %v1535_v30 = vsel %vm3761_vm13, %v3706_v47, %v1531_v5  ;;  %vm1562_vm14 = vweird.f32 %v3720_v15  ;;  %1646 = vmatpush.msra.mxu3 %v1582_v57 }
 0x2d4   : > { %v1544_v1 = vsub.f32 1.0, %v1543_v28  ;;  %v1569_v21 = vor.u32 1.1754944e-38, %v1568_v4  ;;  %v1525_v19 = vsel %vm3775_vm2, %v1524_v25, %v1520_v42  ;;  %v1540_v54 = vsel %vm1537_vm15, %v1539_v29, %v1535_v30  ;;  %v1579_v28 = vld [vmem:[#allocation5 + $0x38] sm:$0xff] }
 0x2d5   : > { %vm1567_vm7 = vcmp.eq.f32.partialorder %v1566_v20, 8.507059e+37  ;;  %v2640_v47 = vpack.i.bf16 %v1540_v54, %v1525_v19  ;;  %1647 = vmatpush.msra.mxu3 %v1580_v53  ;;  %vm1788_vm9 = vcmask 138240   ;;  %vm1863_vm13 = vcmp.lt.s32.totalorder %v3810_v51, 15 }
 0x2d6   : > { %1803 = vperm.xlu1 %2627, %v3731_v36   ;;  %1786 = vrot.lane.b32.xlu0 %v3733_v31, %s2864_s28  ;;  %v1545_v56 = vmul.f32 %v3723_v6, %v1544_v1  ;;  %v1577_v1 = vld [vmem:[#allocation5 + $0x28] sm:$0xff]  ;;  %vm2067_vm15 = vcmask 916480  }
 0x2d7   : > { %1648 = vmatpush.msra.mxu3 %v1578_v11 }
 0x2d8   : > { %v2707_v49 = vpop.eup %2706  ;;  %v1546_v0 = vadd.f32 %v3723_v6, %v1545_v56  ;;  %v1572_v56 = vld [vmem:[#allocation5] sm:$0xff] }
 0x2d9   : > { %v1558_v35 = vmul.f32 %v2707_v49, %v3720_v15  ;;  %vm1563_vm1 = vweird.f32 %v2707_v49  ;;  %v1585_v15 = vld [vmem:[#allocation5 + $0x68] sm:$0xff]  ;;  %1649 = vmatpush.msra.mxu3 %v1576_v59 }
 0x2da   : > { %v1550_v58 = vsel %vm3781_vm4, %v3723_v6, %v1546_v0  ;;  %vm1564_vm5 = vmor %vm1562_vm14, %vm1563_vm1  ;;  %1674 = vmatpush.msrb.mxu2 %v1585_v15  ;;  %v1581_v6 = vld [vmem:[#allocation5 + $0x48] sm:$0xff]  ;;  %vm1879_vm1 = vcmask 121856   ;;  %vm2006_vm14 = vcmask 924672  }
 0x2db   : > { %v1559_v44 = vsub.f32 1.0, %v1558_v35  ;;  %v3796_v48 = vsel %vm1552_vm6, %v1554_v46, %v1550_v58  ;;  %1650 = vmatpush.msra.mxu3 %v1574_v38  ;;  %v4353_v35 = vmov 0   ;;  %vm2152_vm6 = vcmask 261120  }
 0x2dc   : > { %1675 = vmatpush.msrb.mxu2 %v1583_v50  ;;  %v1769_v18 = vsel %vm1768_vm8, 1, %v4353_v35 }
 0x2dd   : > { %v1560_v13 = vmul.f32 %v2707_v49, %v1559_v44  ;;  %1651 = vmatpush.msra.mxu3 %v1572_v56  ;;  %v1770_v23 = vperm.slane %v1769_v18, 0  ;;  %v1771_v32 = vperm.slane %v1769_v18, 1 }
 0x2de   : > { %2639 = vset.pattern.permute.xlu1 %v4332_v62  ;;  %2634 = vrot.lane.b32.xlu0 %v2633_v40, %s4289_s27 }
 0x2df   : > { %1824 = vperm.xlu1 %2639, %v3675_v2   ;;  %v1561_v40 = vadd.f32 %v2707_v49, %v1560_v13  ;;  %1676 = vmatpush.msrb.mxu2 %v1581_v6  ;;  %vm3816_vm11 = vcmp.eq.s32.totalorder %v1770_v23, 1  ;;  %vm3828_vm12 = vcmp.eq.s32.totalorder %v1771_v32, 1 }
 0x2e1   : > { %v1565_v37 = vsel %vm1564_vm5, %v2707_v49, %v1561_v40  ;;  %1677 = vmatpush.msrb.mxu2 %v1579_v28  ;;  %v1573_v49 = vld [vmem:[#allocation5 + $0x8] sm:$0xff]  ;;  %v2866_v40 = vmov 7   ;;  %vm2090_vm5 = vcmask 908288  }
 0x2e2   : > { %v3798_v55 = vsel %vm1567_vm7, %v1569_v21, %v1565_v37  ;;  %2650 = vset.pattern.permute.xlu2 %v2866_v40 }
 0x2e3   : > { %v2645_v14 = vpack.i.bf16 %v3798_v55, %v3796_v48  ;;  %1678 = vmatpush.msrb.mxu2 %v1577_v1  ;;  %v4359_v48 = vmov 4   ;;  %v2868_v55 = vmov 5  }
 0x2e5   : > { %1679 = vmatpush.msrb.mxu2 %v1575_v16  ;;  %v4358_v16 = vmov 3  }
 0x2e6   : > { %1820 = vperm.xlu0 %2638, %v3731_v36  }
 0x2e7   : > { %2641 = vrot.lane.b32.xlu1 %v2640_v47, %s4289_s27  ;;  %1680 = vmatpush.msrb.mxu2 %v1573_v49 }
 0x2e8   : > { %2652 = vset.pattern.permute.xlu1 %v4351_v60 }
 0x2ee   : > { %2651 = vset.pattern.permute.xlu0 %v2866_v40 }
 0x30e   : > { %v1785_v5 = vpop.permute.xlu2 %1784 }
 0x30f   : > { %v1791_v0 = vsel %vm1788_vm9, %v3805_v27, %v1785_v5 }
 0x310   : > { %v1799_v24 = vsel %vm3816_vm11, %v1791_v0, 0.0 }
 0x316   : > { %v1809_v34 = vpop.permute.xlu2 %1808 }
 0x317   : > { %v3822_v41 = vmul.f32 %v1809_v34, %v1799_v24  ;;  %v2872_v24 = vmov 8  }
 0x31e   : > { %v2630_v4 = vpop.permute.xlu2 %2629 }
 0x31f   : > { %v2632_v12 = vunpack.i.h.bf16 %v2630_v4  ;;  %v2631_v33 = vunpack.i.l.bf16 %v2630_v4 }
 0x321   : > { %v1628_v13 = vsel %vm775_vm0, %v2631_v33, %v2632_v12 }
 0x322   : > { %1652 = vmatmul.f32.vlgmr.msra.gmra.mxu3 %v1628_v13  ;;  %1681 = vmatmul.f32.vlgmr.msrb.gmra.mxu2 %v1628_v13 }
 0x340   : > { %v1783_v20 = vpop.permute.xlu1 %1782  ;;  %v1781_v42 = vpop.permute.xlu0 %1780 }
 0x341   : > { %v1790_v22 = vsel %vm1788_vm9, %v1781_v42, %v1783_v20  ;;  %v1789_v30 = vsel %vm1788_vm9, %v3805_v27, %v1781_v42 }
 0x342   : > { %v1797_v29 = vsel %vm3816_vm11, %v1789_v30, 0.0  ;;  %v1798_v46 = vsel %vm3828_vm12, %v1790_v22, 0.0 }
 0x348   : > { %v1804_v25 = vpop.permute.xlu1 %1803  ;;  %v1787_v21 = vpop.permute.xlu0 %1786 }
 0x349   : > { %v3838_v37 = vmul.f32 %v1804_v25, %v1797_v29  ;;  %v3840_v19 = vmul.f32 %v1804_v25, %v1798_v46  ;;  %v1792_v54 = vsel %vm1788_vm9, %v1785_v5, %v1787_v21 }
 0x34a   : > { %v1800_v47 = vsel %vm3828_vm12, %v1792_v54, 0.0 }
 0x34b   : > { %v3845_v3 = vmul.f32 %v1809_v34, %v1800_v47 }
 0x350   : > { %v2635_v9 = vpop.permute.xlu0 %2634 }
 0x351   : > { %v2637_v7 = vunpack.i.h.bf16 %v2635_v9  ;;  %v2636_v61 = vunpack.i.l.bf16 %v2635_v9  ;;  %v1825_v39 = vpop.permute.xlu1 %1824 }
 0x352   : > { %v1830_v26 = vmul.f32 0.0, %v1825_v39  ;;  %v1831_v59 = vmul.f32 %v1825_v39, %v3667_v43  ;;  %v1832_v38 = vmul.f32 %v1825_v39, %v3733_v31 }
 0x353   : > { %v1629_v10 = vsel %vm775_vm0, %v2636_v61, %v2637_v7 }
 0x354   : > { %1845 = vrot.lane.b32.xlu0 %v1830_v26, %s4289_s27  ;;  %1655 = vmatmul.f32.gmra.mxu3 %v1629_v10 }
 0x355   : > { %1684 = vmatmul.f32.gmra.mxu2 %v1629_v10 }
 0x358   : > { %v1821_v15 = vpop.permute.xlu0 %1820 }
 0x359   : > { %v1827_v57 = vmul.f32 0.0, %v1821_v15  ;;  %v1828_v50 = vmul.f32 %v1821_v15, %v3708_v17  ;;  %v2642_v53 = vpop.permute.xlu1 %2641  ;;  %v1829_v1 = vmul.f32 %v1821_v15, %v3710_v45 }
 0x35a   : > { %v2644_v6 = vunpack.i.h.bf16 %v2642_v53  ;;  %v2643_v11 = vunpack.i.l.bf16 %v2642_v53 }
 0x35b   : > { %1841 = vrot.lane.b32.xlu1 %v1828_v50, %s4289_s27  ;;  %1839 = vrot.lane.b32.xlu2 %v1827_v57, %s4289_s27 }
 0x35c   : > { %1869 = vrot.lane.b32.xlu0 %v4331_v52, %s2867_s26  ;;  %v1630_v28 = vsel %vm775_vm0, %v2643_v11, %v2644_v6 }
 0x35d   : > { %1658 = vmatmul.f32.gmra.mxu3 %v1630_v28  ;;  %1687 = vmatmul.f32.gmra.mxu2 %v1630_v28 }
 0x363   : > { %1847 = vrot.lane.b32.xlu1 %v1831_v59, %s4289_s27  ;;  %1843 = vrot.lane.b32.xlu2 %v1829_v1, %s4289_s27 }
 0x364   : > { %1875 = vrot.lane.b32.xlu0 %v3667_v43, %s2867_s26 }
 0x36b   : > { %1871 = vrot.lane.b32.xlu1 %v3708_v17, %s2867_s26  ;;  %2646 = vrot.lane.b32.xlu2 %v2645_v14, %s4289_s27  ;;  %v2870_v14 = vmov 6  }
 0x36c   : > { %2036 = vperm.xlu0 %2651, %v3731_v36  }
 0x373   : > { %1877 = vrot.lane.b32.xlu1 %v3733_v31, %s2867_s26  ;;  %1849 = vrot.lane.b32.xlu2 %v1832_v38, %s4289_s27 }
 0x374   : > { %1912 = vrot.lane.b32.xlu0 %v3667_v43, %s2853_s0 }
 0x375   : > { %2655 = vset.pattern.permute.xlu0 %v4358_v16 }
 0x37b   : > { %1893 = vperm.xlu1 %2652, %v3731_v36   ;;  %1873 = vrot.lane.b32.xlu2 %v3710_v45, %s2867_s26 }
 0x37c   : > { %1929 = vperm.xlu0 %2655, %v3731_v36  }
 0x383   : > { %1908 = vrot.lane.b32.xlu1 %v3708_v17, %s2853_s0  ;;  %2040 = vperm.xlu2 %2650, %v3675_v2  }
 0x384   : > { %1960 = vrot.lane.b32.xlu0 %v3708_v17, %s2857_s21  ;;  %2656 = vset.pattern.permute.xlu1 %v4359_v48 }
 0x385   : > { %2659 = vset.pattern.permute.xlu0 %v2868_v55 }
 0x38b   : > { %1914 = vrot.lane.b32.xlu1 %v3733_v31, %s2853_s0  ;;  %2653 = vset.pattern.permute.xlu2 %v4351_v60 }
 0x38c   : > { %1897 = vperm.xlu2 %2653, %v3675_v2   ;;  %2000 = vrot.lane.b32.xlu0 %v4331_v52, %s2869_s29 }
 0x393   : > { %1949 = vperm.xlu1 %2656, %v3675_v2  }
 0x394   : > { %1910 = vrot.lane.b32.xlu2 %v3710_v45, %s2853_s0  ;;  %1981 = vperm.xlu0 %2659, %v3731_v36  }
 0x395   : > { %2654 = vset.pattern.permute.xlu2 %v4358_v16 }
 0x39b   : > { %1966 = vrot.lane.b32.xlu1 %v3733_v31, %s2857_s21 }
 0x39c   : > { %1933 = vperm.xlu2 %2654, %v3675_v2   ;;  %2660 = vset.pattern.permute.xlu1 %v2870_v14 }
 0x39d   : > { %2084 = vrot.lane.b32.xlu0 %v4331_v52, %s2871_s30 }
 0x39e   : > { %2663 = vset.pattern.permute.xlu0 %v2872_v24 }
 0x3a3   : > { %1962 = vrot.lane.b32.xlu1 %v3710_v45, %s2857_s21 }
 0x3a4   : > { %1964 = vrot.lane.b32.xlu2 %v3667_v43, %s2857_s21 }
 0x3a5   : > { %2657 = vset.pattern.permute.xlu2 %v4359_v48 }
 0x3ab   : > { %2002 = vrot.lane.b32.xlu1 %v3667_v43, %s2869_s29 }
 0x3ac   : > { %1945 = vperm.xlu2 %2657, %v3731_v36  }
 0x3b3   : > { %1996 = vrot.lane.b32.xlu1 %v3708_v17, %s2869_s29 }
 0x3b4   : > { %2658 = vset.pattern.permute.xlu2 %v2868_v55 }
 0x3b5   : > { %1985 = vperm.xlu2 %2658, %v3675_v2   ;;  %v1840_v52 = vpop.permute.xlu2 %1839 }
 0x3bb   : > { %2024 = vperm.xlu1 %2660, %v3675_v2  }
 0x3bd   : > { %2004 = vrot.lane.b32.xlu2 %v3733_v31, %s2869_s29  ;;  %v1844_v56 = vpop.permute.xlu2 %1843 }
 0x3be   : > { %2661 = vset.pattern.permute.xlu2 %v2870_v14 }
 0x3c3   : > { %2086 = vrot.lane.b32.xlu1 %v3667_v43, %s2871_s30 }
 0x3c4   : > { %2664 = vset.pattern.permute.xlu1 %v4353_v35 }
 0x3c5   : > { %1998 = vrot.lane.b32.xlu2 %v3710_v45, %s2869_s29  ;;  %v2647_v49 = vpop.permute.xlu2 %2646 }
 0x3c6   : > { %v2649_v18 = vunpack.i.h.bf16 %v2647_v49  ;;  %v2648_v23 = vunpack.i.l.bf16 %v2647_v49  ;;  %v1846_v5 = vpop.permute.xlu0 %1845 }
 0x3c8   : > { %v1631_v0 = vsel %vm775_vm0, %v2648_v23, %v2649_v18 }
 0x3c9   : > { %1661 = vmatmul.f32.gmra.mxu3 %v1631_v0  ;;  %1690 = vmatmul.f32.gmra.mxu2 %v1631_v0 }
 0x3cd   : > { %v1842_v34 = vpop.permute.xlu1 %1841  ;;  %2020 = vperm.xlu2 %2661, %v3731_v36   ;;  %v1850_v4 = vpop.permute.xlu2 %1849 }
 0x3ce   : > { %v1851_v12 = vsel %vm775_vm0, %v1840_v52, %v1842_v34  ;;  %v1852_v33 = vsel %vm775_vm0, %v1842_v34, %v1844_v56  ;;  %v3931_v42 = vpop.permute.xlu0 %1869 }
 0x3cf   : > { %v1859_v13 = vadd.f32 %v1851_v12, %v3838_v37  ;;  %v1860_v20 = vadd.f32 %v1852_v33, %v3840_v19  ;;  %v1864_v37 = vsel %vm1863_vm13, 1, %v4353_v35 }
 0x3d0   : > { %v1865_v39 = vperm.slane %v1864_v37, 0  ;;  %v1866_v51 = vperm.slane %v1864_v37, 1 }
 0x3d2   : > { %vm3950_vm2 = vcmp.eq.s32.totalorder %v1865_v39, 1  ;;  %vm3955_vm4 = vcmp.eq.s32.totalorder %v1866_v51, 1 }
 0x3d5   : > { %v1848_v22 = vpop.permute.xlu1 %1847  ;;  %2088 = vrot.lane.b32.xlu2 %v3733_v31, %s2871_s30  ;;  %v1874_v32 = vpop.permute.xlu2 %1873 }
 0x3d6   : > { %v1853_v30 = vsel %vm775_vm0, %v1846_v5, %v1848_v22  ;;  %v1854_v25 = vsel %vm775_vm0, %v1848_v22, %v1850_v4  ;;  %2662 = vset.pattern.permute.xlu2 %v2872_v24  ;;  %v1876_v21 = vpop.permute.xlu0 %1875 }
 0x3d7   : > { %v1861_v29 = vadd.f32 %v1853_v30, %v3822_v41  ;;  %v1862_v46 = vadd.f32 %v1854_v25, %v3845_v3  ;;  %v1882_v41 = vsel %vm1879_vm1, %v3931_v42, %v1876_v21  ;;  %v1767_v30 = vld [vmem:[%s4251_s9 + $0x8] sm:$0xff] }
 0x3d8   : > { %v1890_v50 = vsel %vm3950_vm2, %v1882_v41, 0.0  ;;  %v2146_v41 = vld [vmem:[%s4259_s17] sm:$0xff] }
 0x3dd   : > { %v1872_v19 = vpop.permute.xlu1 %1871  ;;  %v2041_v54 = vpop.permute.xlu2 %2040 }
 0x3de   : > { %v1881_v47 = vsel %vm1879_vm1, %v1872_v19, %v1874_v32  ;;  %v2046_v9 = vmul.f32 %v2041_v54, %v3667_v43  ;;  %v2047_v7 = vmul.f32 %v2041_v54, %v3733_v31  ;;  %v2048_v61 = vmul.f32 0.0, %v2041_v54  ;;  %v2037_v3 = vpop.permute.xlu0 %2036 }
 0x3df   : > { %v1880_v1 = vsel %vm1879_vm1, %v3931_v42, %v1872_v19  ;;  %v2045_v52 = vmul.f32 0.0, %v2037_v3  ;;  %v1889_v23 = vsel %vm3955_vm4, %v1881_v47, 0.0  ;;  %v2043_v5 = vmul.f32 %v2037_v3, %v3708_v17 }
 0x3e0   : > { %2063 = vrot.lane.b32.xlu1 %v2047_v7, %s2863_s20  ;;  %2061 = vrot.lane.b32.xlu0 %v2046_v9, %s2863_s20  ;;  %v1888_v18 = vsel %vm3950_vm2, %v1880_v1, 0.0  ;;  %v2044_v0 = vmul.f32 %v2037_v3, %v3710_v45 }
 0x3e1   : > { %2065 = vrot.lane.b32.xlu2 %v2048_v61, %s2863_s20 }
 0x3e5   : > { %v1878_v10 = vpop.permute.xlu1 %1877 }
 0x3e6   : > { %v1883_v15 = vsel %vm1879_vm1, %v1876_v21, %v1878_v10  ;;  %v1898_v53 = vpop.permute.xlu2 %1897  ;;  %v1913_v56 = vpop.permute.xlu0 %1912 }
 0x3e7   : > { %v1891_v6 = vsel %vm3955_vm4, %v1883_v15, 0.0  ;;  %v1902_v11 = vmul.f32 %v1898_v53, %v1890_v50  ;;  %v1918_v22 = vsel %vm906_vm3, %v3190_v63, %v1913_v56 }
 0x3e8   : > { %v1903_v28 = vmul.f32 %v1898_v53, %v1891_v6  ;;  %2082 = vrot.lane.b32.xlu1 %v3710_v45, %s2871_s30  ;;  %2080 = vrot.lane.b32.xlu0 %v3708_v17, %s2871_s30  ;;  %v1926_v25 = vsel %vm3816_vm11, %v1918_v22, 0.0 }
 0x3e9   : > { %v1906_v59 = vadd.f32 %v1902_v11, %v1861_v29  ;;  %2108 = vperm.xlu2 %2662, %v3675_v2  }
 0x3ea   : > { %v1907_v38 = vadd.f32 %v1903_v28, %v1862_v46  ;;  %v1766_v46 = vld [vmem:[%s4251_s9] sm:$0xff] }
 0x3ed   : > { %v1894_v49 = vpop.permute.xlu1 %1893 }
 0x3ee   : > { %v1900_v34 = vmul.f32 %v1894_v49, %v1888_v18  ;;  %v1901_v4 = vmul.f32 %v1894_v49, %v1889_v23  ;;  %v1911_v2 = vpop.permute.xlu2 %1910  ;;  %v1930_v21 = vpop.permute.xlu0 %1929 }
 0x3f0   : > { %v1904_v12 = vadd.f32 %v1900_v34, %v1859_v13  ;;  %v1905_v33 = vadd.f32 %v1901_v4, %v1860_v20  ;;  %2057 = vrot.lane.b32.xlu1 %v2044_v0, %s2863_s20  ;;  %2055 = vrot.lane.b32.xlu0 %v2043_v5, %s2863_s20 }
 0x3f1   : > { %2059 = vrot.lane.b32.xlu2 %v2045_v52, %s2863_s20 }
 0x3f2   : > { %2665 = vset.pattern.permute.xlu2 %v4353_v35 }
 0x3f5   : > { %v1909_v32 = vpop.permute.xlu1 %1908 }
 0x3f6   : > { %v1916_v13 = vsel %vm906_vm3, %v3190_v63, %v1909_v32  ;;  %v1917_v20 = vsel %vm906_vm3, %v1909_v32, %v1911_v2  ;;  %v1934_v29 = vpop.permute.xlu2 %1933  ;;  %v1961_v5 = vpop.permute.xlu0 %1960 }
 0x3f7   : > { %v1924_v37 = vsel %vm3816_vm11, %v1916_v13, 0.0  ;;  %v1925_v19 = vsel %vm3828_vm12, %v1917_v20, 0.0  ;;  %v1938_v54 = vmul.f32 %v1934_v29, %v1926_v25 }
 0x3f8   : > { %v1936_v47 = vmul.f32 %v1930_v21, %v1924_v37  ;;  %v1937_v9 = vmul.f32 %v1930_v21, %v1925_v19  ;;  %2126 = vperm.xlu1 %2664, %v1767_v30   ;;  %2104 = vperm.xlu0 %2663, %v3731_v36   ;;  %v4008_v36 = vld [vmem:[%s4260_s18] sm:$0xff] }
 0x3f9   : > { %v1942_v7 = vadd.f32 %v1938_v54, %v1906_v59  ;;  %2121 = vperm.xlu2 %2665, %v1766_v46  }
 0x3fa   : > { %v1940_v61 = vadd.f32 %v1936_v47, %v1904_v12  ;;  %v1941_v39 = vadd.f32 %v1937_v9, %v1905_v33 }
 0x3fd   : > { %v1915_v51 = vpop.permute.xlu1 %1914 }
 0x3fe   : > { %v1919_v3 = vsel %vm906_vm3, %v1913_v56, %v1915_v51  ;;  %v1965_v10 = vpop.permute.xlu2 %1964  ;;  %v4030_v32 = vpop.permute.xlu0 %2000 }
 0x3ff   : > { %v1927_v15 = vsel %vm3828_vm12, %v1919_v3, 0.0 }
 0x400   : > { %v1939_v50 = vmul.f32 %v1934_v29, %v1927_v15  ;;  %2149 = vperm.xlu1 %2664, %v2146_v41   ;;  %2668 = vset.pattern.permute.xlu0 %v4351_v60 }
 0x401   : > { %2666 = vset.pattern.permute.xlu2 %v4332_v62 }
 0x402   : > { %v1943_v53 = vadd.f32 %v1939_v50, %v1907_v38  ;;  %2220 = vperm.xlu2 %2666, %v4008_v36  }
 0x405   : > { %v1950_v6 = vpop.permute.xlu1 %1949 }
 0x406   : > { %v1954_v11 = vmul.f32 %v1950_v6, %v3667_v43  ;;  %v1955_v28 = vmul.f32 %v1950_v6, %v3733_v31  ;;  %v1946_v59 = vpop.permute.xlu2 %1945  ;;  %v1982_v46 = vpop.permute.xlu0 %1981 }
 0x407   : > { %v1952_v1 = vmul.f32 %v1946_v59, %v3708_v17  ;;  %v1953_v60 = vmul.f32 %v1946_v59, %v3710_v45 }
 0x408   : > { %v1958_v52 = vadd.f32 %v1954_v11, %v1942_v7  ;;  %v1959_v56 = vadd.f32 %v1955_v28, %v1943_v53  ;;  %2212 = vperm.xlu1 %2664, %v4008_v36  }
 0x409   : > { %v1956_v49 = vadd.f32 %v1952_v1, %v1940_v61  ;;  %v1957_v18 = vadd.f32 %v1953_v60, %v1941_v39 }
 0x40a   : > { %2667 = vset.pattern.permute.xlu2 %v2866_v40 }
 0x40b   : > { %2322 = vperm.xlu2 %2667, %v4008_v36  }
 0x40d   : > { %v1967_v62 = vpop.permute.xlu1 %1966 }
 0x40e   : > { %v1970_v38 = vsel %vm981_vm10, %v1965_v10, %v1967_v62  ;;  %v1971_v23 = vsel %vm981_vm10, %v1967_v62, %v3200_v8 }
 0x40f   : > { %v1978_v0 = vsel %vm3950_vm2, %v1970_v38, 0.0  ;;  %v1979_v34 = vsel %vm3955_vm4, %v1971_v23, 0.0  ;;  %v1986_v4 = vpop.permute.xlu2 %1985 }
 0x410   : > { %v1990_v2 = vmul.f32 %v1986_v4, %v1978_v0  ;;  %v1991_v12 = vmul.f32 %v1986_v4, %v1979_v34  ;;  %2669 = vset.pattern.permute.xlu1 %v4358_v16  ;;  %v4062_v0 = vpop.f32.mrf.mxu2 }
 0x411   : > { %2270 = vperm.xlu1 %2669, %v4008_v36  }
 0x412   : > { %v1994_v40 = vadd.f32 %v1990_v2, %v1958_v52  ;;  %v1995_v33 = vadd.f32 %v1991_v12, %v1959_v56 }
 0x413   : > { %2670 = vset.pattern.permute.xlu2 %v4359_v48 }
 0x414   : > { %2278 = vperm.xlu2 %2670, %v4008_v36  }
 0x415   : > { %v1963_v22 = vpop.permute.xlu1 %1962 }
 0x416   : > { %v1968_v20 = vsel %vm981_vm10, %v1961_v5, %v1963_v22  ;;  %v1969_v16 = vsel %vm981_vm10, %v1963_v22, %v3200_v8  ;;  %v4060_v5 = vpop.f32.mrf.mxu3 }
 0x417   : > { %v2005_v30 = vpop.permute.xlu2 %2004  ;;  %v1976_v48 = vsel %vm3950_vm2, %v1968_v20, 0.0  ;;  %v1977_v29 = vsel %vm3955_vm4, %v1969_v16, 0.0 }
 0x418   : > { %v1988_v21 = vmul.f32 %v1982_v46, %v1976_v48  ;;  %v1989_v37 = vmul.f32 %v1982_v46, %v1977_v29  ;;  %v2010_v3 = vsel %vm2006_vm14, %v2005_v30, %v4030_v32 }
 0x419   : > { %v2018_v6 = vsel %vm3828_vm12, %v2010_v3, 0.0 }
 0x41a   : > { %v1992_v61 = vadd.f32 %v1988_v21, %v1956_v49  ;;  %v1993_v39 = vadd.f32 %v1989_v37, %v1957_v18  ;;  %v4058_v49 = vpop.permute.xlu0 %2084 }
 0x41c   : > { %2671 = vset.pattern.permute.xlu2 %v2868_v55 }
 0x41d   : > { %v2003_v13 = vpop.permute.xlu1 %2002  ;;  %2296 = vperm.xlu2 %2671, %v4008_v36  }
 0x41e   : > { %v1656_v12 = vpop.f32.mrf.mxu3 }
 0x41f   : > { %v1999_v25 = vpop.permute.xlu2 %1998 }
 0x420   : > { %v2008_v55 = vsel %vm2006_vm14, %v1999_v25, %v4030_v32 }
 0x421   : > { %v2016_v9 = vsel %vm3828_vm12, %v2008_v55, 0.0 }
 0x425   : > { %v1997_v19 = vpop.permute.xlu1 %1996  ;;  %2672 = vset.pattern.permute.xlu2 %v2870_v14  ;;  %v2009_v14 = vsel %vm2006_vm14, %v2003_v13, %v2005_v30 }
 0x426   : > { %v2007_v54 = vsel %vm2006_vm14, %v1997_v19, %v1999_v25  ;;  %2314 = vperm.xlu2 %2672, %v4008_v36   ;;  %v2017_v53 = vsel %vm3816_vm11, %v2009_v14, 0.0  ;;  %v1659_v37 = vpop.f32.mrf.mxu3 }
 0x427   : > { %v2015_v47 = vsel %vm3816_vm11, %v2007_v54, 0.0  ;;  %v2021_v7 = vpop.permute.xlu2 %2020 }
 0x428   : > { %v2027_v51 = vmul.f32 %v2021_v7, %v2015_v47  ;;  %v2028_v41 = vmul.f32 %v2021_v7, %v2016_v9 }
 0x42a   : > { %v2031_v10 = vadd.f32 %v2027_v51, %v1992_v61  ;;  %v2032_v15 = vadd.f32 %v2028_v41, %v1993_v39 }
 0x42d   : > { %v2025_v50 = vpop.permute.xlu1 %2024 }
 0x42e   : > { %v2029_v11 = vmul.f32 %v2025_v50, %v2017_v53  ;;  %v2030_v28 = vmul.f32 %v2025_v50, %v2018_v6  ;;  %2673 = vset.pattern.permute.xlu2 %v2872_v24  ;;  %v1685_v24 = vpop.f32.mrf.mxu2 }
 0x42f   : > { %v2089_v60 = vpop.permute.xlu2 %2088 }
 0x430   : > { %v2033_v59 = vadd.f32 %v2029_v11, %v1994_v40  ;;  %v2034_v1 = vadd.f32 %v2030_v28, %v1995_v33  ;;  %v2094_v22 = vsel %vm2090_vm5, %v2089_v60, %v4058_v49 }
 0x431   : > { %v2102_v29 = vsel %vm3955_vm4, %v2094_v22, 0.0 }
 0x435   : > { %v2087_v18 = vpop.permute.xlu1 %2086 }
 0x436   : > { %v2093_v30 = vsel %vm2090_vm5, %v2087_v18, %v2089_v60  ;;  %v1688_v55 = vpop.f32.mrf.mxu2 }
 0x437   : > { %v2101_v48 = vsel %vm3950_vm2, %v2093_v30, 0.0 }
 0x43b   : > { %v2066_v52 = vpop.permute.xlu2 %2065 }
 0x443   : > { %v2109_v56 = vpop.permute.xlu2 %2108 }
 0x444   : > { %v2113_v19 = vmul.f32 %v2109_v56, %v2101_v48  ;;  %v2114_v54 = vmul.f32 %v2109_v56, %v2102_v29 }
 0x44b   : > { %v2060_v62 = vpop.permute.xlu2 %2059 }
 0x452   : > { %v2064_v38 = vpop.permute.xlu1 %2063  ;;  %v2062_v23 = vpop.permute.xlu0 %2061 }
 0x453   : > { %v2122_v34 = vpop.permute.xlu2 %2121  ;;  %v2071_v13 = vsel %vm2067_vm15, %v2064_v38, %v2066_v52  ;;  %v2070_v20 = vsel %vm2067_vm15, %v2062_v23, %v2064_v38  ;;  %v1691_v38 = vpop.f32.mrf.mxu2 }
 0x454   : > { %v2079_v46 = vadd.f32 %v2071_v13, %v2034_v1  ;;  %v2078_v21 = vadd.f32 %v2070_v20, %v2033_v59  ;;  %v2139_v13 = vmul.f32 %v3667_v43, %v1656_v12  ;;  %v2140_v20 = vmul.f32 %v3733_v31, %v1685_v24  ;;  %v2709_v24 = vld [vmem:[%s3083_s23] sm:$0xff] }
 0x456   : > { %v2117_v39 = vadd.f32 %v2113_v19, %v2078_v21  ;;  %v2118_v51 = vadd.f32 %v2114_v54, %v2079_v46 }
 0x45a   : > { %v2083_v4 = vpop.permute.xlu1 %2082  ;;  %v2081_v2 = vpop.permute.xlu0 %2080 }
 0x45b   : > { %v2092_v47 = vsel %vm2090_vm5, %v2083_v4, %v4058_v49  ;;  %v2091_v9 = vsel %vm2090_vm5, %v2081_v2, %v2083_v4 }
 0x45c   : > { %v4064_v40 = vpop.permute.xlu2 %2220  ;;  %v2099_v50 = vsel %vm3950_vm2, %v2091_v9, 0.0  ;;  %v2100_v53 = vsel %vm3955_vm4, %v2092_v47, 0.0 }
 0x45d   : > { %v2223_v33 = vmul.f32 0.0, %v4064_v40 }
 0x45f   : > { %2229 = vrot.lane.b32.xlu0 %v2223_v33, %s4289_s27 }
 0x462   : > { %v2058_v16 = vpop.permute.xlu1 %2057  ;;  %v2056_v25 = vpop.permute.xlu0 %2055 }
 0x463   : > { %v2069_v7 = vsel %vm2067_vm15, %v2058_v16, %v2060_v62  ;;  %v2068_v61 = vsel %vm2067_vm15, %v2056_v25, %v2058_v16  ;;  %v1662_v62 = vpop.f32.mrf.mxu3  ;;  %v2137_v16 = vmul.f32 %v3708_v17, %v4060_v5 }
 0x464   : > { %v2077_v41 = vadd.f32 %v2069_v7, %v2032_v15  ;;  %v2076_v3 = vadd.f32 %v2068_v61, %v2031_v10 }
 0x465   : > { %v2323_v48 = vpop.permute.xlu2 %2322 }
 0x466   : > { %v2327_v19 = vmul.f32 0.0, %v2323_v48 }
 0x467   : > { %2252 = vperm.xlu0 %2668, %v4008_v36  }
 0x46a   : > { %v2127_v14 = vpop.permute.xlu1 %2126  ;;  %v2105_v6 = vpop.permute.xlu0 %2104 }
 0x46b   : > { %v2131_v11 = vadd.f32 %v2127_v14, %v2117_v39  ;;  %v2132_v28 = vadd.f32 %v2127_v14, %v2118_v51  ;;  %v2111_v59 = vmul.f32 %v2105_v6, %v2099_v50  ;;  %v2112_v1 = vmul.f32 %v2105_v6, %v2100_v53 }
 0x46d   : > { %v2135_v60 = vmax.f32 %v2131_v11, 0.0  ;;  %v2136_v52 = vmax.f32 %v2132_v28, 0.0  ;;  %v2115_v56 = vadd.f32 %v2111_v59, %v2076_v3  ;;  %v2116_v18 = vadd.f32 %v2112_v1, %v2077_v41 }
 0x46f   : > { %v2143_v15 = vmul.f32 %v2135_v60, %v1662_v62  ;;  %v2144_v10 = vmul.f32 %v2136_v52, %v1691_v38  ;;  %v2129_v23 = vadd.f32 %v2122_v34, %v2115_v56  ;;  %v2130_v4 = vadd.f32 %v2122_v34, %v2116_v18  ;;  %2674 = vset.pattern.permute.xlu0 %v4353_v35  ;;  %v2145_v34 = vld [vmem:[%s4258_s16] sm:$0xff] }
 0x470   : > { %v2138_v35 = vmul.f32 %v3710_v45, %v4062_v0  ;;  %v2708_v0 = vld [vmem:[%s3083_s23 + $0x8] sm:$0xff] }
 0x471   : > { %v2133_v2 = vmax.f32 %v2129_v23, 0.0  ;;  %v2134_v33 = vmax.f32 %v2130_v4, 0.0  ;;  %2168 = vmatpush.msra.mxu0 %v2143_v15  ;;  %2188 = vmatpush.msra.mxu1 %v2144_v10 }
 0x472   : > { %v2150_v43 = vpop.permute.xlu1 %2149 }
 0x473   : > { %v2141_v22 = vmul.f32 %v2133_v2, %v1659_v37  ;;  %v2142_v30 = vmul.f32 %v2134_v33, %v1688_v55  ;;  %v2197_v55 = vld [vmem:[%s4261_s19] sm:$0xff] }
 0x475   : > { %2169 = vmatpush.msra.mxu0 %v2141_v22  ;;  %2189 = vmatpush.msra.mxu1 %v2142_v30 }
 0x477   : > { %2170 = vmatpush.msra.mxu0 %v2139_v13  ;;  %2190 = vmatpush.msra.mxu1 %v2140_v20 }
 0x479   : > { %2171 = vmatpush.msra.mxu0 %v2137_v16  ;;  %2191 = vmatpush.msra.mxu1 %v2138_v35 }
 0x47a   : > { %2503 = vmatmul.msk.f32.vlgmr.msra.gmra.mxu0 %vm2152_vm6, %v2145_v34  ;;  %2504 = vmatmul.msk.f32.vlgmr.msra.gmra.mxu1 %vm2152_vm6, %v2145_v34  ;;  %v2213_v47 = vpop.permute.xlu1 %2212 }
 0x4d1   : > { %v2230_v54 = vpop.permute.xlu0 %2229 }
 0x4d9   : > { %v2253_v7 = vpop.permute.xlu0 %2252 }
 0x4f7   : > { %v2173_v31 = vpop.f32.mrf.mxu0  ;;  %v2193_v17 = vpop.f32.mrf.mxu1 }
 0x4f8   : > { %v4100_v45 = vadd.f32 %v2173_v31, %v2150_v43  ;;  %v4102_v5 = vadd.f32 %v2193_v17, %v2150_v43 }
 0x4fa   : > { %2202 = vrot.lane.b32.xlu0 %v4102_v5, %s2864_s28  ;;  %2241 = vrot.lane.b32.xlu1 %v4100_v45, %s2867_s26  ;;  %v2369_v12 = vadd.f32 %v2708_v0, %v4102_v5  ;;  %v2368_v25 = vadd.f32 %v2709_v24, %v4100_v45  ;;  %v2225_v29 = vmul.f32 %v4064_v40, %v4102_v5 }
 0x4fb   : > { %2200 = vrot.lane.b32.xlu2 %v4100_v45, %s2864_s28  ;;  %v2325_v46 = vmul.f32 %v2323_v48, %v4100_v45  ;;  %v2224_v21 = vmul.f32 %v4064_v40, %v4100_v45  ;;  %v2326_v37 = vmul.f32 %v2323_v48, %v4102_v5  ;;  %v2279_v40 = vpop.permute.xlu2 %2278 }
 0x4fc   : > { %2373 = vst [vmem:[%s4114_s24 + $0x8] sm:$0xff] %v2369_v12 }
 0x4fd   : > { %2372 = vst [vmem:[%s4114_s24] sm:$0xff] %v2368_v25 }
 0x502   : > { %2285 = vrot.lane.b32.xlu0 %v4100_v45, %s2857_s21  ;;  %2259 = vrot.lane.b32.xlu1 %v4100_v45, %s2853_s0 }
 0x503   : > { %2243 = vrot.lane.b32.xlu2 %v4102_v5, %s2867_s26  ;;  %v2297_v9 = vpop.permute.xlu2 %2296 }
 0x50a   : > { %2303 = vrot.lane.b32.xlu0 %v4100_v45, %s2869_s29  ;;  %2287 = vrot.lane.b32.xlu1 %v4102_v5, %s2857_s21 }
 0x50b   : > { %2261 = vrot.lane.b32.xlu2 %v4102_v5, %s2853_s0  ;;  %v4151_v61 = vpop.permute.xlu2 %2314 }
 0x512   : > { %2233 = vrot.lane.b32.xlu0 %v2225_v29, %s4289_s27  ;;  %2305 = vrot.lane.b32.xlu1 %v4102_v5, %s2869_s29  ;;  %v2281_v29 = vmul.f32 %v2279_v40, %v4100_v45  ;;  %s4364_s29 = sld [smem:[#allocation33_spill]] }
 0x513   : > { %2331 = vrot.lane.b32.xlu2 %v2325_v46, %s2863_s20  ;;  %v2282_v46 = vmul.f32 %v2279_v40, %v4102_v5 }
 0x518   : > { %s2792_s26 = scalar_lea.hbm %s4364_s29, 64 }
 0x51a   : > { %2343 = vrot.lane.b32.xlu0 %v4100_v45, %s2871_s30  ;;  %2231 = vrot.lane.b32.xlu1 %v2224_v21, %s4289_s27 }
 0x51b   : > { %2354 = vperm.xlu2 %2673, %v4008_v36   ;;  %v2271_v36 = vpop.permute.xlu1 %2270 }
 0x522   : > { %2333 = vrot.lane.b32.xlu0 %v2326_v37, %s2863_s20  ;;  %2345 = vrot.lane.b32.xlu1 %v4102_v5, %s2871_s30 }
 0x52a   : > { %2335 = vrot.lane.b32.xlu1 %v2327_v19, %s2863_s20  ;;  %2363 = vperm.xlu0 %2674, %v2197_v55   ;;  %s2511_s20 = sshll.u32 %s3000_s2, 5 }
 0x52b   : > { %s2388_s30 = scalar_lea.hbm %s4364_s29, %s2511_s20 }
 0x52c   : > { %s2391_s4 = sshll.u32 %s2388_s30, 4  ;;  %s2392_s4 = int_to_ptr.hbm [resolvable:$true] %s2391_s4 }
 0x52d   : > { %s2786_s0 = sshra.s32 %s2392_s4, 4  ;;  %s2787_s0 = int_to_ptr.hbm [resolvable:$true] %s2786_s0 }
 0x52e   : > { %s2788_s21 = scalar_lea.hbm %s2787_s0, 32  ;;  %p2793_p3 = scmp.lt.s32.totalorder %s2787_s0, %s4364_s29 }
 0x52f   : > { %p2789_p0 = scmp.ne.s32.totalorder %s2787_s0, %s2788_s21  ;;  %p2794_p4 = scmp.lt.s32.totalorder %s2792_s26, %s2788_s21 }
 0x531   : > { %p2790_p1 = pnand %p2789_p0, %p3017_p5  ;;  %p2795_p7 = por %p2794_p4, %p2793_p3 }
 0x533   : > { %p2791_p2 = pneg %p2790_p1 }
 0x535   : > { %p2796_p8 = pnand %p2795_p7, %p2791_p2 }
 0x555   : > { %v2201_v41 = vpop.permute.xlu2 %2200 }
 0x556   : > { %v2204_v1 = vsel %vm1788_vm9, %v3805_v27, %v2201_v41 }
 0x557   : > { %v2208_v18 = vsel %vm3816_vm11, %v2204_v1, 0.0 }
 0x55d   : > { %v2244_v50 = vpop.permute.xlu2 %2243 }
 0x565   : > { %v2262_v59 = vpop.permute.xlu2 %2261 }
 0x56c   : > { %v2203_v39 = vpop.permute.xlu0 %2202  ;;  %v2242_v51 = vpop.permute.xlu1 %2241 }
 0x56d   : > { %v2205_v60 = vsel %vm1788_vm9, %v2201_v41, %v2203_v39  ;;  %v2245_v52 = vsel %vm1879_vm1, %v3931_v42, %v2242_v51  ;;  %v2246_v56 = vsel %vm1879_vm1, %v2242_v51, %v2244_v50  ;;  %v2215_v42 = vmul.f32 %v2213_v47, %v2208_v18  ;;  %v2332_v43 = vpop.permute.xlu2 %2331 }
 0x56e   : > { %v2209_v62 = vsel %vm3828_vm12, %v2205_v60, 0.0  ;;  %v2249_v27 = vsel %vm3950_vm2, %v2245_v52, 0.0  ;;  %v2250_v10 = vsel %vm3955_vm4, %v2246_v56, 0.0  ;;  %v2710_v56 = vld [vmem:[%s3083_s23 + $0x10] sm:$0xff] }
 0x56f   : > { %v2216_v23 = vmul.f32 %v2213_v47, %v2209_v62  ;;  %v2255_v30 = vmul.f32 %v2253_v7, %v2249_v27  ;;  %v2256_v20 = vmul.f32 %v2253_v7, %v2250_v10 }
 0x574   : > { %v2286_v3 = vpop.permute.xlu0 %2285  ;;  %v2260_v14 = vpop.permute.xlu1 %2259 }
 0x575   : > { %v2263_v38 = vsel %vm906_vm3, %v3190_v63, %v2260_v14  ;;  %v2264_v15 = vsel %vm906_vm3, %v2260_v14, %v2262_v59  ;;  %v2355_v44 = vpop.permute.xlu2 %2354 }
 0x576   : > { %v2267_v4 = vsel %vm3816_vm11, %v2263_v38, 0.0  ;;  %v2268_v2 = vsel %vm3828_vm12, %v2264_v15, 0.0  ;;  %v2711_v38 = vld [vmem:[%s3083_s23 + $0x18] sm:$0xff] }
 0x577   : > { %v2273_v31 = vmul.f32 %v2271_v36, %v2267_v4  ;;  %v2274_v17 = vmul.f32 %v2271_v36, %v2268_v2 }
 0x57c   : > { %v2304_v53 = vpop.permute.xlu0 %2303  ;;  %v2288_v6 = vpop.permute.xlu1 %2287 }
 0x57d   : > { %v2289_v16 = vsel %vm981_vm10, %v2286_v3, %v2288_v6  ;;  %v2290_v0 = vsel %vm981_vm10, %v2288_v6, %v3200_v8 }
 0x57e   : > { %v2293_v48 = vsel %vm3950_vm2, %v2289_v16, 0.0  ;;  %v2294_v55 = vsel %vm3955_vm4, %v2290_v0, 0.0 }
 0x57f   : > { %v2299_v8 = vmul.f32 %v2297_v9, %v2293_v48  ;;  %v2300_v5 = vmul.f32 %v2297_v9, %v2294_v55 }
 0x584   : > { %v2234_v11 = vpop.permute.xlu0 %2233  ;;  %v2306_v28 = vpop.permute.xlu1 %2305 }
 0x585   : > { %v2307_v12 = vsel %vm2006_vm14, %v2304_v53, %v2306_v28 }
 0x586   : > { %v2311_v19 = vsel %vm3816_vm11, %v2307_v12, 0.0 }
 0x587   : > { %v2317_v40 = vmul.f32 %v4151_v61, %v2311_v19 }
 0x58c   : > { %v2344_v33 = vpop.permute.xlu0 %2343  ;;  %v2232_v22 = vpop.permute.xlu1 %2231 }
 0x58d   : > { %v2235_v63 = vsel %vm775_vm0, %v2230_v54, %v2232_v22  ;;  %v2236_v13 = vsel %vm775_vm0, %v2232_v22, %v2234_v11  ;;  %v2308_v54 = vsel %vm2006_vm14, %v2306_v28, %v4030_v32 }
 0x58e   : > { %v2239_v35 = vadd.f32 %v2235_v63, %v2215_v42  ;;  %v2240_v34 = vadd.f32 %v2236_v13, %v2216_v23  ;;  %v2312_v41 = vsel %vm3828_vm12, %v2308_v54, 0.0 }
 0x58f   : > { %v2318_v9 = vmul.f32 %v4151_v61, %v2312_v41 }
 0x590   : > { %v2257_v24 = vadd.f32 %v2255_v30, %v2239_v35  ;;  %v2258_v25 = vadd.f32 %v2256_v20, %v2240_v34 }
 0x592   : > { %v2275_v21 = vadd.f32 %v2273_v31, %v2257_v24  ;;  %v2276_v37 = vadd.f32 %v2274_v17, %v2258_v25 }
 0x594   : > { %v2334_v47 = vpop.permute.xlu0 %2333  ;;  %v2283_v36 = vadd.f32 %v2281_v29, %v2275_v21  ;;  %v2346_v7 = vpop.permute.xlu1 %2345  ;;  %v2284_v39 = vadd.f32 %v2282_v46, %v2276_v37 }
 0x595   : > { %v2347_v45 = vsel %vm2090_vm5, %v2344_v33, %v2346_v7  ;;  %v2348_v32 = vsel %vm2090_vm5, %v2346_v7, %v4058_v49  ;;  %v2337_v53 = vsel %vm2067_vm15, %v2332_v43, %v2334_v47 }
 0x596   : > { %v2301_v51 = vadd.f32 %v2299_v8, %v2283_v36  ;;  %v2351_v3 = vsel %vm3950_vm2, %v2347_v45, 0.0  ;;  %v2302_v50 = vadd.f32 %v2300_v5, %v2284_v39  ;;  %v2352_v58 = vsel %vm3955_vm4, %v2348_v32, 0.0 }
 0x597   : > { %v2357_v11 = vmul.f32 %v2355_v44, %v2351_v3  ;;  %v2358_v60 = vmul.f32 %v2355_v44, %v2352_v58 }
 0x598   : > { %v2319_v14 = vadd.f32 %v2317_v40, %v2301_v51  ;;  %v2320_v26 = vadd.f32 %v2318_v9, %v2302_v50 }
 0x59a   : > { %v2341_v6 = vadd.f32 %v2337_v53, %v2319_v14 }
 0x59c   : > { %v2336_v28 = vpop.permute.xlu1 %2335  ;;  %v2364_v59 = vpop.permute.xlu0 %2363  ;;  %v2359_v1 = vadd.f32 %v2357_v11, %v2341_v6 }
 0x59d   : > { %v2338_v49 = vsel %vm2067_vm15, %v2334_v47, %v2336_v28 }
 0x59e   : > { %v2342_v52 = vadd.f32 %v2338_v49, %v2320_v26  ;;  %v2366_v61 = vadd.f32 %v2364_v59, %v2359_v1 }
 0x5a0   : > { %v2360_v57 = vadd.f32 %v2358_v60, %v2342_v52  ;;  %v2370_v18 = vadd.f32 %v2710_v56, %v2366_v61 }
 0x5a2   : > { %v2367_v62 = vadd.f32 %v2364_v59, %v2360_v57  ;;  %2374 = vst [vmem:[%s4114_s24 + $0x10] sm:$0xff] %v2370_v18 }
 0x5a4   : > { %v2371_v15 = vadd.f32 %v2711_v38, %v2367_v62 }
 0x5a6   : > { %2375 = vst [vmem:[%s4114_s24 + $0x18] sm:$0xff] %v2371_v15 }
 0x5a7   : > { %2799 = shalt.err (!%p2796_p8)
}
 0x5a8   : > { %s2873_s23 = smov 256   ;;  %s4366_s1 = smov 16  }
 0x5a9   : > { %2520 = dma.vmem_to_hbm [thread:$0]  (%p3017_p5), %s2390_s3, 512, %s2392_s4, %s2377_s25, %s2873_s23, %s2873_s23, %s4366_s1  }
 0x5aa PF: > { %s4367_s24 = sld [smem:[#allocation13_spill]] }
 0x5ab   : > { %s4368_s5 = sld [smem:[#allocation11_spill]] }
 0x5b0   : > { %p2537_p9 = scmp.ge.s32.totalorder %s4367_s24, 2 }
 0x5b1   : > { %s2406_s20 = sand.u32 1, %s4368_s5  }
 0x5b2   : > { %p2530_p10 = pnand %p2537_p9, %p3021_p6  ;;  %s2407_s27 = scalar_lea.sflag [#allocation4], %s2406_s20 }
 0x5b4   : > { %p2531_p11 = pneg %p2530_p10 }
 0x5b6   : > { %2825 = dma.done.wait (%p2531_p11), %s2407_s27, 512  }
 0x5b7   : > { %2827 = vsyncadd (%p2531_p11), %s2407_s27, 4294966784  ;;  %s4370_s24 = sld [smem:[#allocation14_spill]]  ;;  %s4373_s1 = smov %s2834_s22 }
 0x5b8   : > { %s4371_s0 = sld [smem:[#allocation12_spill]] }
 0x5b9   : > { %s4372_s23 = sld [smem:[#allocation15_spill]] }
 0x5bd   : > { %p32_p12 = scmp.ge.s32.totalorder %s4370_s24, 4  }
 0x5be   : > { %s4374_s22 = smov %s4371_s0 }
 0x5bf   :  { %34 = sbr.rel (!%p32_p12) target bundleno = 14 (0xe), region = 144 }
 0x5c4   :  { %2413 = vsyncpa [#allocation3], 1 }
 0x5c5   :  { %2415 = vsyncpa [#allocation3 + $0x1], 1 }
 0x5c6   :  { %2416 = vsyncpa [#allocation6], 1 }
 0x5c7   :  { %2417 = vsyncpa [#allocation4], 1 }
 0x5c8   :  { %2419 = vsyncpa [#allocation4 + $0x1], 1 }

</bundles_post_ra>
